<compile_context>
chip_gen: v6e
topology: v6e:2x2x1
jax: 0.10.0
libtpu: 0.0.40
codegen_flags: <defaults>
</compile_context>

<pallas_src>
import functools

import jax
import jax.numpy as jnp
from jax.experimental import pallas as pl
from jax.experimental.pallas import tpu as pltpu

_MIB = 1024 * 1024


def _round_up(x: int, m: int) -> int:
    return ((x + m - 1) // m) * m


def _pick_tile(dim: int, cap: int) -> int:
    """Largest tile <= cap that divides dim (dim is a multiple of 8/128 here)."""
    t = min(cap, dim)
    while dim % t != 0:
        t //= 2
    return max(t, 1)


def _default_vmem_limit() -> int:
    """Generation-aware scoped-VMEM limit (~85% of physical VMEM)."""
    try:
        cap = int(pltpu.get_tpu_info().vmem_capacity_bytes)
    except Exception:
        cap = 64 * _MIB  # conservative (v7x-sized) fallback
    return max(32 * _MIB, cap * 85 // 100)


def _pad2(a, shape, dtype):
    a = a.astype(dtype)
    if a.shape == tuple(shape):
        return a
    return jnp.zeros(shape, dtype).at[: a.shape[0], : a.shape[1]].set(a)


# ---------------------------------------------------------------------------
# Fully fused path: one pallas_call, weights VMEM-resident, activation scratch
# ---------------------------------------------------------------------------
def _fused_mlp_kernel(x_ref, w1_ref, b1_ref, w2_ref, b2_ref, w3_ref, b3_ref,
                      w4_ref, b4_ref, o_ref, h_ref):
    """o = relu(relu(relu(relu(x@W1+b1)@W2+b2)@W3+b3)@W4+b4).

    Matmuls accumulate in f32 on the MXU; bias-add / ReLU epilogue is f32 on
    the VPU; the inter-layer activation lives in the w_dtype VMEM scratch
    h_ref and never round-trips to HBM.
    """
    acc = jnp.dot(x_ref[...], w1_ref[...], preferred_element_type=jnp.float32)
    h_ref[...] = jnp.maximum(acc + b1_ref[...], 0.0).astype(h_ref.dtype)

    acc = jnp.dot(h_ref[...], w2_ref[...], preferred_element_type=jnp.float32)
    h_ref[...] = jnp.maximum(acc + b2_ref[...], 0.0).astype(h_ref.dtype)

    acc = jnp.dot(h_ref[...], w3_ref[...], preferred_element_type=jnp.float32)
    h_ref[...] = jnp.maximum(acc + b3_ref[...], 0.0).astype(h_ref.dtype)

    acc = jnp.dot(h_ref[...], w4_ref[...], preferred_element_type=jnp.float32)
    o_ref[...] = jnp.maximum(acc + b4_ref[...], 0.0).astype(o_ref.dtype)


# ---------------------------------------------------------------------------
# Tiled per-layer fallback: Linear+bias+ReLU with (M, N, K) grid
# ---------------------------------------------------------------------------
def _linear_relu_tiled_kernel(x_ref, w_ref, b_ref, o_ref, acc_ref):
    @pl.when(pl.program_id(2) == 0)
    def _():
        acc_ref[...] = jnp.zeros_like(acc_ref)

    acc_ref[...] += jnp.dot(x_ref[...], w_ref[...],
                            preferred_element_type=jnp.float32)

    @pl.when(pl.program_id(2) == pl.num_programs(2) - 1)
    def _():
        o_ref[...] = jnp.maximum(acc_ref[...] + b_ref[...], 0.0).astype(o_ref.dtype)


def _linear_relu_tiled(x_p, w_p, b_p, out_dtype, vmem_limit_bytes):
    M, K = x_p.shape
    _, N = w_p.shape
    tm = _pick_tile(M, 256)
    tn = _pick_tile(N, 512)
    tk = _pick_tile(K, 512)
    grid = (M // tm, N // tn, K // tk)
    return pl.pallas_call(
        _linear_relu_tiled_kernel,
        out_shape=jax.ShapeDtypeStruct((M, N), out_dtype),
        grid=grid,
        in_specs=[pl.BlockSpec((tm, tk), lambda i, j, k: (i, k)),
                  pl.BlockSpec((tk, tn), lambda i, j, k: (k, j)),
                  pl.BlockSpec((1, tn), lambda i, j, k: (0, j))],
        out_specs=pl.BlockSpec((tm, tn), lambda i, j, k: (i, j)),
        scratch_shapes=[pltpu.VMEM((tm, tn), jnp.float32)],
        compiler_params=pltpu.CompilerParams(
            dimension_semantics=("parallel", "parallel", "arbitrary"),
            vmem_limit_bytes=vmem_limit_bytes),
    )(x_p, w_p, b_p)


def _tiled_mlp(x_p, prepared, out_dtype, vmem_limit_bytes):
    # TODO(synk): a fully-fused streamed-weight variant (weights in pl.ANY +
    # pltpu.emit_pipeline per layer) would also keep activations in VMEM; the
    # per-layer tiled kernels below are the simpler, robust fallback for
    # hidden sizes whose weights don't fit VMEM-resident (e.g. hidden=5000).
    (w1p, b1p), (w2p, b2p), (w3p, b3p), (w4p, b4p) = prepared["params"]
    w_dtype = prepared["w_dtype"]
    h = _linear_relu_tiled(x_p, w1p, b1p, w_dtype, vmem_limit_bytes)
    h = _linear_relu_tiled(h, w2p, b2p, w_dtype, vmem_limit_bytes)
    h = _linear_relu_tiled(h, w3p, b3p, w_dtype, vmem_limit_bytes)
    return _linear_relu_tiled(h, w4p, b4p, out_dtype, vmem_limit_bytes)


# ---------------------------------------------------------------------------
# Param preparation (one-time padding / dtype cast, hoisted out of forward)
# ---------------------------------------------------------------------------
def prepare_toy_model_params(params, w_dtype=jnp.bfloat16):
    """Pad weights to lane-dense (128-multiple) feature dims and cast once.

    Weights are stored (in, out); biases stay f32 so the epilogue math is f32
    even with bf16 weights (v5e has no bf16 VPU path).
    """
    assert len(params) == 4, "ToyModel wrapped by FakeDDP has 4 Linear+ReLU layers"
    (w1, b1), (w2, b2), (w3, b3), (w4, b4) = params
    K0, H = w1.shape
    N = w4.shape[1]
    assert w2.shape == (H, H) and w3.shape == (H, H) and w4.shape == (H, N)

    K0p, Hp, Np = _round_up(K0, 128), _round_up(H, 128), _round_up(N, 128)
    in_dims = [K0p, Hp, Hp, Hp]
    out_dims = [Hp, Hp, Hp, Np]

    padded = []
    for (w, b), ip, op in zip(params, in_dims, out_dims):
        wp = _pad2(w, (ip, op), w_dtype)
        bp = _pad2(b.reshape(1, -1), (1, op), jnp.float32)
        padded.append((wp, bp))

    return {"params": padded,
            "dims": (K0, H, N),
            "padded_dims": (K0p, Hp, Np),
            "w_dtype": w_dtype}


# ---------------------------------------------------------------------------
# Forward
# ---------------------------------------------------------------------------
def fused_mlp(x, prepared, *, batch_tile=512, vmem_limit_bytes=None,
              force_tiled=False):
    """Run the 4x (Linear -> ReLU) ToyModel MLP; fused single kernel when the
    padded weights fit VMEM-resident, tiled per-layer kernels otherwise."""
    (w1p, b1p), (w2p, b2p), (w3p, b3p), (w4p, b4p) = prepared["params"]
    K0, H, N = prepared["dims"]
    K0p, Hp, Np = prepared["padded_dims"]
    w_dtype = prepared["w_dtype"]

    B, K = x.shape
    assert K == K0, (K, K0)
    out_dtype = x.dtype
    if vmem_limit_bytes is None:
        vmem_limit_bytes = _default_vmem_limit()

    # Batch tiling: big tiles feed the 256x256 MXU; >= 2 grid steps whenever
    # B > 8 so v7x's 2 TensorCores both get work.
    if B <= 8:
        TB = 8
    else:
        TB = min(batch_tile, _round_up(-(-B // 2), 8))
    Bp = _round_up(B, TB)

    x_p = _pad2(x, (Bp, K0p), w_dtype)

    w_item = jnp.dtype(w_dtype).itemsize
    out_item = jnp.dtype(out_dtype).itemsize
    weight_bytes = (K0p * Hp + 2 * Hp * Hp + Hp * Np) * w_item   # single-buffered
    bias_bytes = (3 * Hp + Np) * 4                               # single-buffered
    io_bytes = 2 * TB * (K0p * w_item + Np * out_item)           # double-buffered
    scratch_bytes = TB * Hp * w_item
    slack = 4 * _MIB                                             # compiler scratch etc.
    fused_fits = (weight_bytes + bias_bytes + io_bytes + scratch_bytes + slack
                  <= vmem_limit_bytes)

    if force_tiled or not fused_fits:
        out_p = _tiled_mlp(x_p, prepared, out_dtype, vmem_limit_bytes)
        return out_p[:B, :N]

    args = (x_p, w1p, b1p, w2p, b2p, w3p, b3p, w4p, b4p)
    const = lambda i: (0, 0)          # weights/biases resident across batch tiles
    batch_map = lambda i: (i, 0)
    flops = 2 * Bp * (K0p * Hp + 2 * Hp * Hp + Hp * Np)
    bytes_accessed = (x_p.size * w_item + weight_bytes + bias_bytes
                      + Bp * Np * out_item)

    def build(single_buffer_weights):
        resident_kw = ({"pipeline_mode": pl.Buffered(1)}
                       if single_buffer_weights else {})
        return pl.pallas_call(
            _fused_mlp_kernel,
            out_shape=jax.ShapeDtypeStruct((Bp, Np), out_dtype),
            grid=(Bp // TB,),
            in_specs=[
                pl.BlockSpec((TB, K0p), batch_map),                # x (pipelined)
                pl.BlockSpec((K0p, Hp), const, **resident_kw),     # W1
                pl.BlockSpec((1, Hp), const, **resident_kw),       # b1
                pl.BlockSpec((Hp, Hp), const, **resident_kw),      # W2
                pl.BlockSpec((1, Hp), const, **resident_kw),       # b2
                pl.BlockSpec((Hp, Hp), const, **resident_kw),      # W3
                pl.BlockSpec((1, Hp), const, **resident_kw),       # b3
                pl.BlockSpec((Hp, Np), const, **resident_kw),      # W4
                pl.BlockSpec((1, Np), const, **resident_kw),       # b4
            ],
            out_specs=pl.BlockSpec((TB, Np), batch_map),
            scratch_shapes=[pltpu.VMEM((TB, Hp), w_dtype)],
            compiler_params=pltpu.CompilerParams(
                dimension_semantics=("parallel",),
                vmem_limit_bytes=vmem_limit_bytes),
            cost_estimate=pl.CostEstimate(
                flops=flops, transcendentals=0, bytes_accessed=bytes_accessed),
        )

    try:
        out_p = build(True)(*args)
    except Exception:
        # This JAX/Mosaic build rejected single-buffering (pl.Buffered(1)):
        # retry with default double-buffered weights if they still fit,
        # otherwise fall back to the tiled per-layer path.
        if (2 * (weight_bytes + bias_bytes) + io_bytes + scratch_bytes + slack
                <= vmem_limit_bytes):
            out_p = build(False)(*args)
        else:
            out_p = _tiled_mlp(x_p, prepared, out_dtype, vmem_limit_bytes)
    return out_p[:B, :N]


def init_toy_model_params(key, in_feat, hidden_feat, out_feat):
    """Deterministic f32 params for the 4-layer ToyModel MLP (weights (in, out),
    i.e. the transpose of nn.Linear's (out, in)); cast/pad once with
    prepare_toy_model_params (bf16 by default on all TPU generations)."""
    dims = [(in_feat, hidden_feat),
            (hidden_feat, hidden_feat),
            (hidden_feat, hidden_feat),
            (hidden_feat, out_feat)]
    params = []
    for (k_in, k_out) in dims:
        key, kw, kb = jax.random.split(key, 3)
        bound = 1.0 / jnp.sqrt(jnp.asarray(k_in, dtype=jnp.float32))
        w = jax.random.uniform(kw, (k_in, k_out), jnp.float32, -bound, bound)
        b = jax.random.uniform(kb, (k_out,), jnp.float32, -bound, bound)
        params.append((w, b))
    return params


def fake_ddp_forward(prepared_params, x):
    """FakeDDP.forward: _inside_ddp_forward only toggles DDP._active_ddp_module
    (pure Python bookkeeping, no numerical effect), so the forward is exactly
    the wrapped ToyModel forward: 4 x (Linear -> ReLU), run as Pallas kernels."""
    # TODO(synk): DDP._active_ddp_module / bucket_bytes_cap bookkeeping has no
    # Pallas equivalent; it is a no-op on the numerical path.
    return fused_mlp(x, prepared_params)


if __name__ == "__main__":
    key = jax.random.PRNGKey(0)
    key, kx = jax.random.split(key)

    # Small shapes consistent with ToyModel(in_feat, hidden_feat, out_feat).
    batch, in_feat, hidden_feat, out_feat = 16, 16, 64, 8
    x = jax.random.normal(kx, (batch, in_feat), jnp.float32)

    raw_params = init_toy_model_params(key, in_feat, hidden_feat, out_feat)
    prepared = prepare_toy_model_params(raw_params, w_dtype=jnp.bfloat16)

    # Fused path (exercises a 2-step batch grid with resident bf16 weights).
    out = jax.block_until_ready(fake_ddp_forward(prepared, x))
    # Tiled fallback path (used for large hidden sizes, e.g. hidden_feat=5000).
    out_tiled = jax.block_until_ready(fused_mlp(x, prepared, force_tiled=True))

    # Reference mimicking the kernel precision: bf16 weights/x/intermediate
    # activations, f32 accumulation and f32 bias/ReLU epilogue.
    def ref_forward(params, xin, w_dtype):
        h = xin.astype(w_dtype).astype(jnp.float32)
        for i, (w, b) in enumerate(params):
            w32 = w.astype(w_dtype).astype(jnp.float32)
            h = jnp.maximum(h @ w32 + b.astype(jnp.float32), 0.0)
            if i < len(params) - 1:
                h = h.astype(w_dtype).astype(jnp.float32)
        return h

    ref = ref_forward(raw_params, x, jnp.bfloat16)

    assert out.shape == (batch, out_feat), out.shape
    assert out_tiled.shape == (batch, out_feat), out_tiled.shape
    assert jnp.allclose(out, ref, atol=1e-2, rtol=1e-2), "fused path mismatch"
    assert jnp.allclose(out_tiled, ref, atol=1e-2, rtol=1e-2), "tiled path mismatch"

    print("KERNEL_OK")
</pallas_src>

<mosaic_0001>
module attributes {stable_mosaic.version = 11 : i64} {
  func.func @_fused_mlp_kernel(%arg0: i32, %arg1: memref<8x128xbf16, #tpu.memory_space<vmem>>, %arg2: memref<128x128xbf16, #tpu.memory_space<vmem>>, %arg3: memref<1x128xf32, #tpu.memory_space<vmem>>, %arg4: memref<128x128xbf16, #tpu.memory_space<vmem>>, %arg5: memref<1x128xf32, #tpu.memory_space<vmem>>, %arg6: memref<128x128xbf16, #tpu.memory_space<vmem>>, %arg7: memref<1x128xf32, #tpu.memory_space<vmem>>, %arg8: memref<128x128xbf16, #tpu.memory_space<vmem>>, %arg9: memref<1x128xf32, #tpu.memory_space<vmem>>, %arg10: memref<8x128xf32, #tpu.memory_space<vmem>>, %arg11: memref<8x128xbf16, #tpu.memory_space<vmem>>) attributes {dimension_semantics = [#tpu.dimension_semantics<parallel>], iteration_bounds = array<i64: 2>, scalar_prefetch = 0 : i64, scratch_operands = 1 : i64, tpu.core_type = #tpu.core_type<tc>, window_params = [{transform_indices = @transform_0, window_bounds = array<i64: 8, 128>}, {pipeline_mode = #tpu.pipeline_mode<synchronous>, transform_indices = @transform_1, window_bounds = array<i64: 128, 128>}, {pipeline_mode = #tpu.pipeline_mode<synchronous>, transform_indices = @transform_2, window_bounds = array<i64: 1, 128>}, {pipeline_mode = #tpu.pipeline_mode<synchronous>, transform_indices = @transform_3, window_bounds = array<i64: 128, 128>}, {pipeline_mode = #tpu.pipeline_mode<synchronous>, transform_indices = @transform_4, window_bounds = array<i64: 1, 128>}, {pipeline_mode = #tpu.pipeline_mode<synchronous>, transform_indices = @transform_5, window_bounds = array<i64: 128, 128>}, {pipeline_mode = #tpu.pipeline_mode<synchronous>, transform_indices = @transform_6, window_bounds = array<i64: 1, 128>}, {pipeline_mode = #tpu.pipeline_mode<synchronous>, transform_indices = @transform_7, window_bounds = array<i64: 128, 128>}, {pipeline_mode = #tpu.pipeline_mode<synchronous>, transform_indices = @transform_8, window_bounds = array<i64: 1, 128>}, {transform_indices = @transform_9, window_bounds = array<i64: 8, 128>}]} {
    %c0 = arith.constant 0 : index
    %c0_0 = arith.constant 0 : index
    %0 = vector.load %arg1[%c0, %c0_0] : memref<8x128xbf16, #tpu.memory_space<vmem>>, vector<8x128xbf16>
    %c0_1 = arith.constant 0 : index
    %c0_2 = arith.constant 0 : index
    %1 = vector.load %arg2[%c0_1, %c0_2] : memref<128x128xbf16, #tpu.memory_space<vmem>>, vector<128x128xbf16>
    %cst = arith.constant dense<0.000000e+00> : vector<8x128xf32>
    %2 = tpu.matmul %0, %1, %cst {dimension_numbers = #tpu.dot_dimension_numbers<[1], [0], [0], [1], [0, 0, 1, 1], [], []>} : vector<8x128xbf16>, vector<128x128xbf16>, vector<8x128xf32> -> vector<8x128xf32>
    %c0_3 = arith.constant 0 : index
    %c0_4 = arith.constant 0 : index
    %3 = vector.load %arg3[%c0_3, %c0_4] : memref<1x128xf32, #tpu.memory_space<vmem>>, vector<1x128xf32>
    %4 = vector.broadcast %3 : vector<1x128xf32> to vector<8x128xf32>
    %5 = arith.addf %2, %4 : vector<8x128xf32>
    %cst_5 = arith.constant 0.000000e+00 : f32
    %6 = vector.broadcast %cst_5 : f32 to vector<8x128xf32>
    %7 = arith.maximumf %5, %6 : vector<8x128xf32>
    %8 = arith.truncf %7 : vector<8x128xf32> to vector<8x128xbf16>
    %c0_6 = arith.constant 0 : index
    %c0_7 = arith.constant 0 : index
    %9 = vector.load %arg11[%c0_6, %c0_7] : memref<8x128xbf16, #tpu.memory_space<vmem>>, vector<8x128xbf16>
    tpu.vector_store %arg11[%c0_6, %c0_7], %8 {strides = array<i32>} : memref<8x128xbf16, #tpu.memory_space<vmem>>, vector<8x128xbf16>,
    %c0_8 = arith.constant 0 : index
    %c0_9 = arith.constant 0 : index
    %10 = vector.load %arg11[%c0_8, %c0_9] : memref<8x128xbf16, #tpu.memory_space<vmem>>, vector<8x128xbf16>
    %c0_10 = arith.constant 0 : index
    %c0_11 = arith.constant 0 : index
    %11 = vector.load %arg4[%c0_10, %c0_11] : memref<128x128xbf16, #tpu.memory_space<vmem>>, vector<128x128xbf16>
    %cst_12 = arith.constant dense<0.000000e+00> : vector<8x128xf32>
    %12 = tpu.matmul %10, %11, %cst_12 {dimension_numbers = #tpu.dot_dimension_numbers<[1], [0], [0], [1], [0, 0, 1, 1], [], []>} : vector<8x128xbf16>, vector<128x128xbf16>, vector<8x128xf32> -> vector<8x128xf32>
    %c0_13 = arith.constant 0 : index
    %c0_14 = arith.constant 0 : index
    %13 = vector.load %arg5[%c0_13, %c0_14] : memref<1x128xf32, #tpu.memory_space<vmem>>, vector<1x128xf32>
    %14 = vector.broadcast %13 : vector<1x128xf32> to vector<8x128xf32>
    %15 = arith.addf %12, %14 : vector<8x128xf32>
    %cst_15 = arith.constant 0.000000e+00 : f32
    %16 = vector.broadcast %cst_15 : f32 to vector<8x128xf32>
    %17 = arith.maximumf %15, %16 : vector<8x128xf32>
    %18 = arith.truncf %17 : vector<8x128xf32> to vector<8x128xbf16>
    %c0_16 = arith.constant 0 : index
    %c0_17 = arith.constant 0 : index
    %19 = vector.load %arg11[%c0_16, %c0_17] : memref<8x128xbf16, #tpu.memory_space<vmem>>, vector<8x128xbf16>
    tpu.vector_store %arg11[%c0_16, %c0_17], %18 {strides = array<i32>} : memref<8x128xbf16, #tpu.memory_space<vmem>>, vector<8x128xbf16>,
    %c0_18 = arith.constant 0 : index
    %c0_19 = arith.constant 0 : index
    %20 = vector.load %arg11[%c0_18, %c0_19] : memref<8x128xbf16, #tpu.memory_space<vmem>>, vector<8x128xbf16>
    %c0_20 = arith.constant 0 : index
    %c0_21 = arith.constant 0 : index
    %21 = vector.load %arg6[%c0_20, %c0_21] : memref<128x128xbf16, #tpu.memory_space<vmem>>, vector<128x128xbf16>
    %cst_22 = arith.constant dense<0.000000e+00> : vector<8x128xf32>
    %22 = tpu.matmul %20, %21, %cst_22 {dimension_numbers = #tpu.dot_dimension_numbers<[1], [0], [0], [1], [0, 0, 1, 1], [], []>} : vector<8x128xbf16>, vector<128x128xbf16>, vector<8x128xf32> -> vector<8x128xf32>
    %c0_23 = arith.constant 0 : index
    %c0_24 = arith.constant 0 : index
    %23 = vector.load %arg7[%c0_23, %c0_24] : memref<1x128xf32, #tpu.memory_space<vmem>>, vector<1x128xf32>
    %24 = vector.broadcast %23 : vector<1x128xf32> to vector<8x128xf32>
    %25 = arith.addf %22, %24 : vector<8x128xf32>
    %cst_25 = arith.constant 0.000000e+00 : f32
    %26 = vector.broadcast %cst_25 : f32 to vector<8x128xf32>
    %27 = arith.maximumf %25, %26 : vector<8x128xf32>
    %28 = arith.truncf %27 : vector<8x128xf32> to vector<8x128xbf16>
    %c0_26 = arith.constant 0 : index
    %c0_27 = arith.constant 0 : index
    %29 = vector.load %arg11[%c0_26, %c0_27] : memref<8x128xbf16, #tpu.memory_space<vmem>>, vector<8x128xbf16>
    tpu.vector_store %arg11[%c0_26, %c0_27], %28 {strides = array<i32>} : memref<8x128xbf16, #tpu.memory_space<vmem>>, vector<8x128xbf16>,
    %c0_28 = arith.constant 0 : index
    %c0_29 = arith.constant 0 : index
    %30 = vector.load %arg11[%c0_28, %c0_29] : memref<8x128xbf16, #tpu.memory_space<vmem>>, vector<8x128xbf16>
    %c0_30 = arith.constant 0 : index
    %c0_31 = arith.constant 0 : index
    %31 = vector.load %arg8[%c0_30, %c0_31] : memref<128x128xbf16, #tpu.memory_space<vmem>>, vector<128x128xbf16>
    %cst_32 = arith.constant dense<0.000000e+00> : vector<8x128xf32>
    %32 = tpu.matmul %30, %31, %cst_32 {dimension_numbers = #tpu.dot_dimension_numbers<[1], [0], [0], [1], [0, 0, 1, 1], [], []>} : vector<8x128xbf16>, vector<128x128xbf16>, vector<8x128xf32> -> vector<8x128xf32>
    %c0_33 = arith.constant 0 : index
    %c0_34 = arith.constant 0 : index
    %33 = vector.load %arg9[%c0_33, %c0_34] : memref<1x128xf32, #tpu.memory_space<vmem>>, vector<1x128xf32>
    %34 = vector.broadcast %33 : vector<1x128xf32> to vector<8x128xf32>
    %35 = arith.addf %32, %34 : vector<8x128xf32>
    %cst_35 = arith.constant 0.000000e+00 : f32
    %36 = vector.broadcast %cst_35 : f32 to vector<8x128xf32>
    %37 = arith.maximumf %35, %36 : vector<8x128xf32>
    %c0_36 = arith.constant 0 : index
    %c0_37 = arith.constant 0 : index
    %38 = vector.load %arg10[%c0_36, %c0_37] : memref<8x128xf32, #tpu.memory_space<vmem>>, vector<8x128xf32>
    tpu.vector_store %arg10[%c0_36, %c0_37], %37 {strides = array<i32>} : memref<8x128xf32, #tpu.memory_space<vmem>>, vector<8x128xf32>,
    return
  }
  func.func @transform_0(%arg0: i32) -> (i32, i32) {
    %c0_i32 = arith.constant 0 : i32
    %c0_i32_0 = arith.constant 0 : i32
    return %arg0, %c0_i32 : i32, i32
  }
  func.func @transform_1(%arg0: i32) -> (i32, i32) {
    %c0_i32 = arith.constant 0 : i32
    %c0_i32_0 = arith.constant 0 : i32
    %c0_i32_1 = arith.constant 0 : i32
    return %c0_i32, %c0_i32_0 : i32, i32
  }
  func.func @transform_2(%arg0: i32) -> (i32, i32) {
    %c0_i32 = arith.constant 0 : i32
    %c0_i32_0 = arith.constant 0 : i32
    %c0_i32_1 = arith.constant 0 : i32
    return %c0_i32, %c0_i32_0 : i32, i32
  }
  func.func @transform_3(%arg0: i32) -> (i32, i32) {
    %c0_i32 = arith.constant 0 : i32
    %c0_i32_0 = arith.constant 0 : i32
    %c0_i32_1 = arith.constant 0 : i32
    return %c0_i32, %c0_i32_0 : i32, i32
  }
  func.func @transform_4(%arg0: i32) -> (i32, i32) {
    %c0_i32 = arith.constant 0 : i32
    %c0_i32_0 = arith.constant 0 : i32
    %c0_i32_1 = arith.constant 0 : i32
    return %c0_i32, %c0_i32_0 : i32, i32
  }
  func.func @transform_5(%arg0: i32) -> (i32, i32) {
    %c0_i32 = arith.constant 0 : i32
    %c0_i32_0 = arith.constant 0 : i32
    %c0_i32_1 = arith.constant 0 : i32
    return %c0_i32, %c0_i32_0 : i32, i32
  }
  func.func @transform_6(%arg0: i32) -> (i32, i32) {
    %c0_i32 = arith.constant 0 : i32
    %c0_i32_0 = arith.constant 0 : i32
    %c0_i32_1 = arith.constant 0 : i32
    return %c0_i32, %c0_i32_0 : i32, i32
  }
  func.func @transform_7(%arg0: i32) -> (i32, i32) {
    %c0_i32 = arith.constant 0 : i32
    %c0_i32_0 = arith.constant 0 : i32
    %c0_i32_1 = arith.constant 0 : i32
    return %c0_i32, %c0_i32_0 : i32, i32
  }
  func.func @transform_8(%arg0: i32) -> (i32, i32) {
    %c0_i32 = arith.constant 0 : i32
    %c0_i32_0 = arith.constant 0 : i32
    %c0_i32_1 = arith.constant 0 : i32
    return %c0_i32, %c0_i32_0 : i32, i32
  }
  func.func @transform_9(%arg0: i32) -> (i32, i32) {
    %c0_i32 = arith.constant 0 : i32
    %c0_i32_0 = arith.constant 0 : i32
    return %arg0, %c0_i32 : i32, i32
  }
}

module attributes {stable_mosaic.version = 11 : i64} {
  func.func @_fused_mlp_kernel(%arg0: i32, %arg1: memref<8x128xbf16, #tpu.memory_space<vmem>>, %arg2: memref<128x128xbf16, #tpu.memory_space<vmem>>, %arg3: memref<1x128xf32, #tpu.memory_space<vmem>>, %arg4: memref<128x128xbf16, #tpu.memory_space<vmem>>, %arg5: memref<1x128xf32, #tpu.memory_space<vmem>>, %arg6: memref<128x128xbf16, #tpu.memory_space<vmem>>, %arg7: memref<1x128xf32, #tpu.memory_space<vmem>>, %arg8: memref<128x128xbf16, #tpu.memory_space<vmem>>, %arg9: memref<1x128xf32, #tpu.memory_space<vmem>>, %arg10: memref<8x128xf32, #tpu.memory_space<vmem>>, %arg11: memref<8x128xbf16, #tpu.memory_space<vmem>>) attributes {dimension_semantics = [#tpu.dimension_semantics<parallel>], iteration_bounds = array<i64: 2>, scalar_prefetch = 0 : i64, scratch_operands = 1 : i64, tpu.core_type = #tpu.core_type<tc>, window_params = [{transform_indices = @transform_0, window_bounds = array<i64: 8, 128>}, {pipeline_mode = #tpu.pipeline_mode<synchronous>, transform_indices = @transform_1, window_bounds = array<i64: 128, 128>}, {pipeline_mode = #tpu.pipeline_mode<synchronous>, transform_indices = @transform_2, window_bounds = array<i64: 1, 128>}, {pipeline_mode = #tpu.pipeline_mode<synchronous>, transform_indices = @transform_3, window_bounds = array<i64: 128, 128>}, {pipeline_mode = #tpu.pipeline_mode<synchronous>, transform_indices = @transform_4, window_bounds = array<i64: 1, 128>}, {pipeline_mode = #tpu.pipeline_mode<synchronous>, transform_indices = @transform_5, window_bounds = array<i64: 128, 128>}, {pipeline_mode = #tpu.pipeline_mode<synchronous>, transform_indices = @transform_6, window_bounds = array<i64: 1, 128>}, {pipeline_mode = #tpu.pipeline_mode<synchronous>, transform_indices = @transform_7, window_bounds = array<i64: 128, 128>}, {pipeline_mode = #tpu.pipeline_mode<synchronous>, transform_indices = @transform_8, window_bounds = array<i64: 1, 128>}, {transform_indices = @transform_9, window_bounds = array<i64: 8, 128>}]} {
    %c0 = arith.constant 0 : index
    %c0_0 = arith.constant 0 : index
    %0 = vector.load %arg1[%c0, %c0_0] : memref<8x128xbf16, #tpu.memory_space<vmem>>, vector<8x128xbf16>
    %c0_1 = arith.constant 0 : index
    %c0_2 = arith.constant 0 : index
    %1 = vector.load %arg2[%c0_1, %c0_2] : memref<128x128xbf16, #tpu.memory_space<vmem>>, vector<128x128xbf16>
    %cst = arith.constant dense<0.000000e+00> : vector<8x128xf32>
    %2 = tpu.matmul %0, %1, %cst {dimension_numbers = #tpu.dot_dimension_numbers<[1], [0], [0], [1], [0, 0, 1, 1], [], []>} : vector<8x128xbf16>, vector<128x128xbf16>, vector<8x128xf32> -> vector<8x128xf32>
    %c0_3 = arith.constant 0 : index
    %c0_4 = arith.constant 0 : index
    %3 = vector.load %arg3[%c0_3, %c0_4] : memref<1x128xf32, #tpu.memory_space<vmem>>, vector<1x128xf32>
    %4 = vector.broadcast %3 : vector<1x128xf32> to vector<8x128xf32>
    %5 = arith.addf %2, %4 : vector<8x128xf32>
    %cst_5 = arith.constant 0.000000e+00 : f32
    %6 = vector.broadcast %cst_5 : f32 to vector<8x128xf32>
    %7 = arith.maximumf %5, %6 : vector<8x128xf32>
    %8 = arith.truncf %7 : vector<8x128xf32> to vector<8x128xbf16>
    %c0_6 = arith.constant 0 : index
    %c0_7 = arith.constant 0 : index
    %9 = vector.load %arg11[%c0_6, %c0_7] : memref<8x128xbf16, #tpu.memory_space<vmem>>, vector<8x128xbf16>
    tpu.vector_store %arg11[%c0_6, %c0_7], %8 {strides = array<i32>} : memref<8x128xbf16, #tpu.memory_space<vmem>>, vector<8x128xbf16>,
    %c0_8 = arith.constant 0 : index
    %c0_9 = arith.constant 0 : index
    %10 = vector.load %arg11[%c0_8, %c0_9] : memref<8x128xbf16, #tpu.memory_space<vmem>>, vector<8x128xbf16>
    %c0_10 = arith.constant 0 : index
    %c0_11 = arith.constant 0 : index
    %11 = vector.load %arg4[%c0_10, %c0_11] : memref<128x128xbf16, #tpu.memory_space<vmem>>, vector<128x128xbf16>
    %cst_12 = arith.constant dense<0.000000e+00> : vector<8x128xf32>
    %12 = tpu.matmul %10, %11, %cst_12 {dimension_numbers = #tpu.dot_dimension_numbers<[1], [0], [0], [1], [0, 0, 1, 1], [], []>} : vector<8x128xbf16>, vector<128x128xbf16>, vector<8x128xf32> -> vector<8x128xf32>
    %c0_13 = arith.constant 0 : index
    %c0_14 = arith.constant 0 : index
    %13 = vector.load %arg5[%c0_13, %c0_14] : memref<1x128xf32, #tpu.memory_space<vmem>>, vector<1x128xf32>
    %14 = vector.broadcast %13 : vector<1x128xf32> to vector<8x128xf32>
    %15 = arith.addf %12, %14 : vector<8x128xf32>
    %cst_15 = arith.constant 0.000000e+00 : f32
    %16 = vector.broadcast %cst_15 : f32 to vector<8x128xf32>
    %17 = arith.maximumf %15, %16 : vector<8x128xf32>
    %18 = arith.truncf %17 : vector<8x128xf32> to vector<8x128xbf16>
    %c0_16 = arith.constant 0 : index
    %c0_17 = arith.constant 0 : index
    %19 = vector.load %arg11[%c0_16, %c0_17] : memref<8x128xbf16, #tpu.memory_space<vmem>>, vector<8x128xbf16>
    tpu.vector_store %arg11[%c0_16, %c0_17], %18 {strides = array<i32>} : memref<8x128xbf16, #tpu.memory_space<vmem>>, vector<8x128xbf16>,
    %c0_18 = arith.constant 0 : index
    %c0_19 = arith.constant 0 : index
    %20 = vector.load %arg11[%c0_18, %c0_19] : memref<8x128xbf16, #tpu.memory_space<vmem>>, vector<8x128xbf16>
    %c0_20 = arith.constant 0 : index
    %c0_21 = arith.constant 0 : index
    %21 = vector.load %arg6[%c0_20, %c0_21] : memref<128x128xbf16, #tpu.memory_space<vmem>>, vector<128x128xbf16>
    %cst_22 = arith.constant dense<0.000000e+00> : vector<8x128xf32>
    %22 = tpu.matmul %20, %21, %cst_22 {dimension_numbers = #tpu.dot_dimension_numbers<[1], [0], [0], [1], [0, 0, 1, 1], [], []>} : vector<8x128xbf16>, vector<128x128xbf16>, vector<8x128xf32> -> vector<8x128xf32>
    %c0_23 = arith.constant 0 : index
    %c0_24 = arith.constant 0 : index
    %23 = vector.load %arg7[%c0_23, %c0_24] : memref<1x128xf32, #tpu.memory_space<vmem>>, vector<1x128xf32>
    %24 = vector.broadcast %23 : vector<1x128xf32> to vector<8x128xf32>
    %25 = arith.addf %22, %24 : vector<8x128xf32>
    %cst_25 = arith.constant 0.000000e+00 : f32
    %26 = vector.broadcast %cst_25 : f32 to vector<8x128xf32>
    %27 = arith.maximumf %25, %26 : vector<8x128xf32>
    %28 = arith.truncf %27 : vector<8x128xf32> to vector<8x128xbf16>
    %c0_26 = arith.constant 0 : index
    %c0_27 = arith.constant 0 : index
    %29 = vector.load %arg11[%c0_26, %c0_27] : memref<8x128xbf16, #tpu.memory_space<vmem>>, vector<8x128xbf16>
    tpu.vector_store %arg11[%c0_26, %c0_27], %28 {strides = array<i32>} : memref<8x128xbf16, #tpu.memory_space<vmem>>, vector<8x128xbf16>,
    %c0_28 = arith.constant 0 : index
    %c0_29 = arith.constant 0 : index
    %30 = vector.load %arg11[%c0_28, %c0_29] : memref<8x128xbf16, #tpu.memory_space<vmem>>, vector<8x128xbf16>
    %c0_30 = arith.constant 0 : index
    %c0_31 = arith.constant 0 : index
    %31 = vector.load %arg8[%c0_30, %c0_31] : memref<128x128xbf16, #tpu.memory_space<vmem>>, vector<128x128xbf16>
    %cst_32 = arith.constant dense<0.000000e+00> : vector<8x128xf32>
    %32 = tpu.matmul %30, %31, %cst_32 {dimension_numbers = #tpu.dot_dimension_numbers<[1], [0], [0], [1], [0, 0, 1, 1], [], []>} : vector<8x128xbf16>, vector<128x128xbf16>, vector<8x128xf32> -> vector<8x128xf32>
    %c0_33 = arith.constant 0 : index
    %c0_34 = arith.constant 0 : index
    %33 = vector.load %arg9[%c0_33, %c0_34] : memref<1x128xf32, #tpu.memory_space<vmem>>, vector<1x128xf32>
    %34 = vector.broadcast %33 : vector<1x128xf32> to vector<8x128xf32>
    %35 = arith.addf %32, %34 : vector<8x128xf32>
    %cst_35 = arith.constant 0.000000e+00 : f32
    %36 = vector.broadcast %cst_35 : f32 to vector<8x128xf32>
    %37 = arith.maximumf %35, %36 : vector<8x128xf32>
    %c0_36 = arith.constant 0 : index
    %c0_37 = arith.constant 0 : index
    %38 = vector.load %arg10[%c0_36, %c0_37] : memref<8x128xf32, #tpu.memory_space<vmem>>, vector<8x128xf32>
    tpu.vector_store %arg10[%c0_36, %c0_37], %37 {strides = array<i32>} : memref<8x128xf32, #tpu.memory_space<vmem>>, vector<8x128xf32>,
    return
  }
  func.func @transform_0(%arg0: i32) -> (i32, i32) {
    %c0_i32 = arith.constant 0 : i32
    %c0_i32_0 = arith.constant 0 : i32
    return %arg0, %c0_i32 : i32, i32
  }
  func.func @transform_1(%arg0: i32) -> (i32, i32) {
    %c0_i32 = arith.constant 0 : i32
    %c0_i32_0 = arith.constant 0 : i32
    %c0_i32_1 = arith.constant 0 : i32
    return %c0_i32, %c0_i32_0 : i32, i32
  }
  func.func @transform_2(%arg0: i32) -> (i32, i32) {
    %c0_i32 = arith.constant 0 : i32
    %c0_i32_0 = arith.constant 0 : i32
    %c0_i32_1 = arith.constant 0 : i32
    return %c0_i32, %c0_i32_0 : i32, i32
  }
  func.func @transform_3(%arg0: i32) -> (i32, i32) {
    %c0_i32 = arith.constant 0 : i32
    %c0_i32_0 = arith.constant 0 : i32
    %c0_i32_1 = arith.constant 0 : i32
    return %c0_i32, %c0_i32_0 : i32, i32
  }
  func.func @transform_4(%arg0: i32) -> (i32, i32) {
    %c0_i32 = arith.constant 0 : i32
    %c0_i32_0 = arith.constant 0 : i32
    %c0_i32_1 = arith.constant 0 : i32
    return %c0_i32, %c0_i32_0 : i32, i32
  }
  func.func @transform_5(%arg0: i32) -> (i32, i32) {
    %c0_i32 = arith.constant 0 : i32
    %c0_i32_0 = arith.constant 0 : i32
    %c0_i32_1 = arith.constant 0 : i32
    return %c0_i32, %c0_i32_0 : i32, i32
  }
  func.func @transform_6(%arg0: i32) -> (i32, i32) {
    %c0_i32 = arith.constant 0 : i32
    %c0_i32_0 = arith.constant 0 : i32
    %c0_i32_1 = arith.constant 0 : i32
    return %c0_i32, %c0_i32_0 : i32, i32
  }
  func.func @transform_7(%arg0: i32) -> (i32, i32) {
    %c0_i32 = arith.constant 0 : i32
    %c0_i32_0 = arith.constant 0 : i32
    %c0_i32_1 = arith.constant 0 : i32
    return %c0_i32, %c0_i32_0 : i32, i32
  }
  func.func @transform_8(%arg0: i32) -> (i32, i32) {
    %c0_i32 = arith.constant 0 : i32
    %c0_i32_0 = arith.constant 0 : i32
    %c0_i32_1 = arith.constant 0 : i32
    return %c0_i32, %c0_i32_0 : i32, i32
  }
  func.func @transform_9(%arg0: i32) -> (i32, i32) {
    %c0_i32 = arith.constant 0 : i32
    %c0_i32_0 = arith.constant 0 : i32
    return %arg0, %c0_i32 : i32, i32
  }
}

</mosaic_0001>

<bundles_post_ra>
// kernel: tpu_custom_call.1
= control target key start
LH: loop header
LB: loop body
LE: loop exit
PB: predicated region body
PF: predicated region fallthrough
CT: control target
= control target key end

     0   :  { %s1832_s0 = inlined_call_operand.hbm [shape: bf16[16,128], index: 0, kind: input, shape index: {}]   ;;  %s1833_s1 = inlined_call_operand.hbm [shape: bf16[128,128], index: 1, kind: input, shape index: {}]   ;;  %s1834_s2 = inlined_call_operand.vmem [shape: f32[1,128], index: 2, kind: input, shape index: {}]   ;;  %s1835_s3 = inlined_call_operand.hbm [shape: bf16[128,128], index: 3, kind: input, shape index: {}]   ;;  %s1836_s4 = inlined_call_operand.vmem [shape: f32[1,128], index: 4, kind: input, shape index: {}]   ;;  %s1837_s5 = inlined_call_operand.hbm [shape: bf16[128,128], index: 5, kind: input, shape index: {}]   ;;  %s1838_s6 = inlined_call_operand.vmem [shape: f32[1,128], index: 6, kind: input, shape index: {}]   ;;  %s1839_s7 = inlined_call_operand.hbm [shape: bf16[128,128], index: 7, kind: input, shape index: {}]   ;;  %s1840_s8 = inlined_call_operand.vmem [shape: f32[1,128], index: 8, kind: input, shape index: {}]   ;;  %s1841_s9 = inlined_call_operand.hbm [shape: f32[16,128], index: 9, kind: output, shape index: {}]  }
   0x1   :  { %1846 = sst [smem:[#allocation17_spill]] %s1833_s1 }
   0x2   :  { %1847 = sst [smem:[#allocation18_spill]] %s1835_s3 }
   0x3   :  { %1848 = sst [smem:[#allocation19_spill]] %s1837_s5 }
   0x4   :  { %1849 = sst [smem:[#allocation20_spill]] %s1839_s7 }
   0x5   :  { %14 = vsyncpa [#allocation4], 0 }
   0x6   :  { %16 = vsyncpa [#allocation4 + $0x1], 0 }
   0x7   :  { %17 = vsyncpa [#allocation7], 0 }
   0x8   :  { %18 = vsyncpa [#allocation10], 0 }
   0x9   :  { %19 = vsyncpa [#allocation5], 0 }
   0xa   :  { %21 = vsyncpa [#allocation5 + $0x1], 0  ;;  %s1549_s30 = smov 0   ;;  %s1551_s10 = smov 0  }
   0xb   :  { %s1553_s11 = smov 0   ;;  %s1555_s12 = smov 0  }
   0xc LB: > { %s1489_s13 = smov [#allocation6]   ;;  %s1570_s15 = sadd.s32 4294967295, %s1487_s12   ;;  %s1487_s12 = sphi %s1555_s12, %s1873_s12   ;;  %s1483_s11 = sphi %s1553_s11, %s1872_s11   ;;  %s1479_s10 = sphi %s1551_s10, %s1871_s10   ;;  %s1475_s30 = sphi %s1549_s30, %s1870_s30  }
   0xd   : > { %s264_s14 = sshll.u32 %s1489_s13, 4  ;;  %p989_p0 = scmp.ge.s32.totalorder %s1487_s12, 1  ;;  %s265_s14 = int_to_ptr.vmem [resolvable:$true] %s264_s14 }
   0xe   : > { %p1842_p1 = scmp.eq.s32.totalorder %s1570_s15, 0  ;;  %p252_p2 = scmp.lt.s32.totalorder %s1487_s12, 3 }
   0xf   : > { %s1490_s17 = smov [#allocation9]   ;;  %s1491_s20 = smov [#allocation8]  }
  0x10   : > { %p1575_p3 = pnand %p989_p0, %p252_p2  ;;  %s296_s18 = sshll.u32 %s1490_s17, 4  ;;  %s1588_s18 = int_to_ptr.vmem [resolvable:$true] %s296_s18 }
  0x11   : > { %s280_s21 = sshll.u32 %s1491_s20, 4  ;;  %s1294_s22 = scalar_lea.vmem %s265_s14, 1024  ;;  %s1590_s21 = int_to_ptr.vmem [resolvable:$true] %s280_s21 }
  0x12   : > { %s1850_s16 = scalar_select %p1575_p3, 1, 0 }
  0x13   : > { %p1180_p5 = pneg %p1575_p3  ;;  %p1295_p8 = scmp.ne.s32.totalorder %s265_s14, %s1294_s22 }
  0x14   : > { %p1302_p11 = scmp.lt.s32.totalorder %s265_s14, %s265_s14  ;;  %p1303_p12 = scmp.lt.s32.totalorder %s1294_s22, %s1294_s22 }
  0x15   : > { %p1584_p6 = pnand %p1180_p5, %p1842_p1 }
  0x16   : > { %p1304_p13 = por %p1303_p12, %p1302_p11 }
  0x17   : > { %p1285_p7 = pneg %p1584_p6 }
  0x19   : > { %p1297_p9 = pnand %p1295_p8, %p1285_p7 }
  0x1b   : > { %p1298_p10 = pneg %p1297_p9 }
  0x1d   : > { %p1305_p0 = pnand %p1304_p13, %p1298_p10 }
  0x1f   : > { %1308 = shalt.err (!%p1305_p0)
}
  0x20   : > { %s1492_s23 = smov 64   ;;  %s1493_s24 = smov 4  }
  0x21   : > { %s1852_s1 = sld [smem:[#allocation17_spill]]  ;;  %s1320_s27 = scalar_lea.vmem %s1588_s18, 1024 }
  0x22   : > { %p1321_p2 = scmp.ne.s32.totalorder %s1588_s18, %s1320_s27  ;;  %p1328_p9 = scmp.lt.s32.totalorder %s1588_s18, %s1588_s18 }
  0x23   : > { %p1329_p10 = scmp.lt.s32.totalorder %s1320_s27, %s1320_s27 }
  0x24   : > { %p1323_p5 = pnand %p1321_p2, %p1285_p7 }
  0x25   : > { %p1330_p11 = por %p1329_p10, %p1328_p9 }
  0x26   : > { %p1324_p8 = pneg %p1323_p5 }
  0x27   : > { %1183 = dma.hbm_to_vmem [thread:$0]  (!%p1584_p6), %s1852_s1, 1024, %s265_s14, [#allocation7], %s1492_s23, %s1492_s23, %s1493_s24  }
  0x28   : > { %p1331_p12 = pnand %p1330_p11, %p1324_p8 }
  0x2a   : > { %1334 = shalt.err (!%p1331_p12)
}
  0x2b   : > { %s1853_s5 = sld [smem:[#allocation19_spill]]  ;;  %s1346_s13 = scalar_lea.vmem %s1590_s21, 1024 }
  0x2c   : > { %p1347_p13 = scmp.ne.s32.totalorder %s1590_s21, %s1346_s13  ;;  %p1354_p5 = scmp.lt.s32.totalorder %s1590_s21, %s1590_s21 }
  0x2d   : > { %p1355_p8 = scmp.lt.s32.totalorder %s1346_s13, %s1346_s13 }
  0x2e   : > { %p1349_p0 = pnand %p1347_p13, %p1285_p7 }
  0x2f   : > { %p1356_p9 = por %p1355_p8, %p1354_p5 }
  0x30   : > { %p1350_p2 = pneg %p1349_p0 }
  0x31   : > { %1189 = dma.hbm_to_vmem [thread:$0]  (!%p1584_p6), %s1853_s5, 1024, %s1588_s18, [#allocation10], %s1492_s23, %s1492_s23, %s1493_s24  }
  0x32   : > { %p1357_p10 = pnand %p1356_p9, %p1350_p2 }
  0x34   : > { %1360 = shalt.err (!%p1357_p10)
}
  0x35   : > { %s1854_s3 = sld [smem:[#allocation18_spill]]  ;;  %s1494_s18 = smov [#allocation11]  }
  0x36   : > { %s312_s20 = sshll.u32 %s1494_s18, 4  ;;  %s313_s20 = int_to_ptr.vmem [resolvable:$true] %s312_s20 }
  0x37   : > { %s1372_s22 = scalar_lea.vmem %s313_s20, 1024  ;;  %p1380_p0 = scmp.lt.s32.totalorder %s313_s20, %s313_s20 }
  0x38   : > { %p1373_p11 = scmp.ne.s32.totalorder %s313_s20, %s1372_s22  ;;  %p1381_p2 = scmp.lt.s32.totalorder %s1372_s22, %s1372_s22 }
  0x3a   : > { %p1375_p12 = pnand %p1373_p11, %p1285_p7  ;;  %p1382_p5 = por %p1381_p2, %p1380_p0 }
  0x3b   : > { %1186 = dma.hbm_to_vmem [thread:$0]  (!%p1584_p6), %s1854_s3, 1024, %s1590_s21, [#allocation7], %s1492_s23, %s1492_s23, %s1493_s24  }
  0x3c   : > { %p1376_p13 = pneg %p1375_p12 }
  0x3e   : > { %p1383_p8 = pnand %p1382_p5, %p1376_p13 }
  0x40   : > { %1386 = shalt.err (!%p1383_p8)
}
  0x41   : > { %s1855_s7 = sld [smem:[#allocation20_spill]]  ;;  %s988_s19 = sadd.s32 4294967294, %s1487_s12  }
  0x42   : > { %s1650_s26 = sadd.s32 1, %s1487_s12   ;;  %s34_s28 = sadd.s32 1, %s1483_s11 }
  0x43   : > { %s31_s27 = ssub.s32 %s1487_s12, %s1650_s26  ;;  %p41_p9 = scmp.ne.s32.totalorder %s1483_s11, %s1479_s10 }
  0x44   : > { %p32_p7 = scmp.eq.s32.totalorder %s31_s27, 0  ;;  %p42_p10 = scmp.eq.s32.totalorder %s1487_s12, 0 }
  0x45   : > { %p47_p11 = scmp.ne.s32.totalorder %s1479_s10, %s1475_s30  ;;  %p239_p13 = scmp.eq.s32.totalorder %s1570_s15, 1 }
  0x46   : > { %s1661_s29 = scalar_select %p32_p7, %s1483_s11, %s34_s28  }
  0x47   : > { %1192 = dma.hbm_to_vmem [thread:$0]  (!%p1584_p6), %s1855_s7, 1024, %s313_s20, [#allocation10], %s1492_s23, %s1492_s23, %s1493_s24  }
  0x48   : > { %p1663_p12 = por %p42_p10, %p41_p9  ;;  %p1669_p6 = por %p1842_p1, %p47_p11 }
  0x49   : > { %p245_p0 = scmp.eq.s32.totalorder %s988_s19, 1  ;;  %p1205_p2 = scmp.lt.s32.totalorder %s1487_s12, 2 }
  0x4a   : > { %s1857_s23 = scalar_select %p1669_p6, 1, 0 }
  0x4b   : > { %s329_s24 = sand.u32 1, %s1483_s11   ;;  %p1676_p5 = por %p239_p13, %p41_p9 }
  0x4c   : > { %p1680_p8 = por %p245_p0, %p47_p11  ;;  %s995_s18 = sshll.u32 %s329_s24, 2 }
  0x4d   : > { %s1858_s14 = scalar_select %p1676_p5, 1, 0 }
  0x4e   : > { %s1859_s17 = scalar_select %p1680_p8, 1, 0 }
  0x4f   : > { %s996_s20 = sshll.u32 %s1487_s12, 6  ;;  %s333_s19 = scalar_lea.vmem [#allocation3], %s995_s18 }
  0x50   : > { %s1688_s25 = scalar_lea.hbm %s1832_s0, %s996_s20  ;;  %s340_s27 = sshll.u32 %s333_s19, 4  ;;  %s341_s27 = int_to_ptr.vmem [resolvable:$true] %s340_s27 }
  0x51   : > { %p1692_p7 = pnand %p1205_p2, %p1663_p12  ;;  %s330_s1 = scalar_lea.sflag [#allocation4], %s329_s24 }
  0x52   : > { %s1387_s3 = scalar_lea.hbm %s1688_s25, 64  ;;  %s1392_s21 = scalar_lea.hbm %s1832_s0, 128 }
  0x53   : > { %p1388_p9 = scmp.ne.s32.totalorder %s1688_s25, %s1387_s3  ;;  %p1389_p10 = pneg %p1692_p7 }
  0x54   : > { %p1393_p0 = scmp.lt.s32.totalorder %s1688_s25, %s1832_s0  ;;  %p1394_p12 = scmp.lt.s32.totalorder %s1392_s21, %s1387_s3 }
  0x55   : > { %p1390_p11 = pnand %p1389_p10, %p1388_p9 }
  0x56   : > { %p1395_p2 = por %p1394_p12, %p1393_p0 }
  0x57   : > { %p1391_p13 = pneg %p1390_p11 }
  0x59   : > { %p1396_p4 = pnand %p1395_p2, %p1391_p13 }
  0x5b   : > { %1399 = shalt.err (!%p1396_p4)
}
  0x5c   : > { %s1400_s13 = scalar_lea.vmem %s341_s27, 64  ;;  %s1495_s24 = smov [#allocation3]  }
  0x5d   : > { %p1401_p1 = scmp.ne.s32.totalorder %s341_s27, %s1400_s13  ;;  %s1405_s5 = sshll.u32 %s1495_s24, 4  ;;  %s1406_s5 = int_to_ptr.vmem [resolvable:$false] %s1405_s5 }
  0x5e   : > { %s1407_s7 = scalar_lea.vmem %s1406_s5, 128  ;;  %p1408_p9 = scmp.lt.s32.totalorder %s341_s27, %s1406_s5 }
  0x5f   : > { %p1403_p8 = pnand %p1401_p1, %p1389_p10  ;;  %p1409_p11 = scmp.lt.s32.totalorder %s1407_s7, %s1400_s13 }
  0x61   : > { %p1404_p5 = pneg %p1403_p8  ;;  %p1410_p6 = por %p1409_p11, %p1408_p9 }
  0x63   : > { %p1411_p3 = pnand %p1410_p6, %p1404_p5 }
  0x65   : > { %1414 = shalt.err (!%p1411_p3)
}
  0x66   : > { %1196 = dma.hbm_to_vmem [thread:$0]  (!%p1692_p7), %s1688_s25, 64, %s341_s27, %s330_s1  }
  0x67   : > { %p1861_p13 = scmp.ne.s32.totalorder %s1850_s16, 0 }
  0x68   : > { %s1713_s3 = sand.u32 (!%p1861_p13), 1, %s1479_s10   ;;  %p1862_p1 = scmp.ne.s32.totalorder (!%p1861_p13), %s1857_s23, 0 }
  0x69   : > { %349 = sbr.rel (%p1861_p13) target bundleno = 983 (0x3d7), region = 56  ;;  %s998_s20 = sshll.u32 (!%p1861_p13), %s1713_s3, 2 }
  0x6a   : > { %s352_s22 = scalar_lea.sflag (!%p1861_p13), [#allocation4], %s1713_s3  ;;  %s1717_s5 = scalar_lea.vmem (!%p1861_p13), [#allocation3], %s998_s20 }
  0x6e   : > { %1458 = dma.done.wait (%p1862_p1), %s352_s22, 64  }
  0x6f   : > { %1460 = vsyncadd (%p1862_p1), %s352_s22, 4294967232  ;;  %p1863_p3 = scmp.eq.s32.totalorder %s1570_s15, 0 }
  0x71   : > { %1462 = dma.done.wait (%p1863_p3), [#allocation7], 2048   ;;  %p1864_p4 = pmov %p1863_p3 }
  0x72   : > { %p1865_p6 = pmov %p1863_p3 }
  0x73   : > { %1464 = vsyncadd (%p1864_p4), [#allocation7], 4294965248 }
  0x74   : > { %1466 = dma.done.wait (%p1865_p6), [#allocation10], 2048   ;;  %p1866_p5 = pmov %p1863_p3 }
  0x75   : > { %v1496_v0 = vmov 0.0   ;;  %vm1497_vm0 = vmmov 0   ;;  %v1251_v1 = vld [vmem:[#allocation6 + $0x38] sm:$0xff]   ;;  %v1252_v2 = vld [vmem:[#allocation6 + $0x30] sm:$0xff]   ;;  %v1253_v3 = vld [vmem:[#allocation6 + $0x28] sm:$0xff]   ;;  %s1003_s28 = sshll.u32 %s1713_s3, 3 }
  0x76   : > { %1468 = vsyncadd (%p1866_p5), [#allocation10], 4294965248  ;;  %1080 = vmatprep.subr.bf16.mxu0 %v1496_v0  ;;  %1096 = vmatprep.mubr.msk.bf16.mxu0 %vm1497_vm0, %v1496_v0  ;;  %v1259_v4 = vld [vmem:[#allocation8 + $0x38] sm:$0xff]   ;;  %v1254_v5 = vld [vmem:[#allocation6 + $0x20] sm:$0xff]   ;;  %s1041_s19 = sshll.u32 %s1570_s15, 7  ;;  %s405_s13 = scalar_lea.vmem [#allocation12], %s1003_s28 }
  0x77   : > { %1100 = vmatprep.subr.bf16.mxu1 %v1496_v0  ;;  %1116 = vmatprep.mubr.msk.bf16.mxu1 %vm1497_vm0, %v1496_v0  ;;  %v1260_v6 = vld [vmem:[#allocation8 + $0x30] sm:$0xff]   ;;  %v1255_v7 = vld [vmem:[#allocation6 + $0x18] sm:$0xff]   ;;  %v1261_v8 = vld [vmem:[#allocation8 + $0x28] sm:$0xff]   ;;  %s880_s24 = sshll.u32 %s405_s13, 4  ;;  %s867_s1 = scalar_lea.sflag [#allocation5], %s1713_s3  ;;  %s1791_s24 = int_to_ptr.vmem [resolvable:$true] %s880_s24 }
  0x78   : > { %1081 = vmatpush3.bf16.msra.mxu0 %v1251_v1  ;;  %1101 = vmatpush3.bf16.msra.mxu1 %v1259_v4  ;;  %v1256_v9 = vld [vmem:[#allocation6 + $0x10] sm:$0xff]   ;;  %v1262_v10 = vld [vmem:[#allocation8 + $0x20] sm:$0xff]   ;;  %v1257_v11 = vld [vmem:[#allocation6 + $0x8] sm:$0xff]   ;;  %s1415_s15 = scalar_lea.vmem %s1791_s24, 128  ;;  %p1867_p7 = scmp.ne.s32.totalorder %s1858_s14, 0 }
  0x79   : > { %1082 = vmatprep.subr.bf16.mxu0 %v1496_v0  ;;  %1102 = vmatprep.subr.bf16.mxu1 %v1496_v0  ;;  %v1258_v12 = vld [vmem:[#allocation6] sm:$0xff]   ;;  %v407_v13 = vld [vmem:[%s1717_s5] sm:$0xf]  ;;  %v1264_v15 = vld [vmem:[#allocation8 + $0x10] sm:$0xff]   ;;  %s1789_s5 = scalar_lea.hbm %s1841_s9, %s1041_s19  ;;  %p1416_p8 = scmp.ne.s32.totalorder %s1791_s24, %s1415_s15 }
  0x7a   : > { %v1263_v14 = vld [vmem:[#allocation8 + $0x18] sm:$0xff]   ;;  %v1265_v16 = vld [vmem:[#allocation8 + $0x8] sm:$0xff]   ;;  %v1266_v17 = vld [vmem:[#allocation8] sm:$0xff]   ;;  %s1498_s7 = smov [#allocation12]  }
  0x7b   : > { %v1267_v18 = vld [vmem:[#allocation9 + $0x38] sm:$0xff]   ;;  %v1268_v19 = vld [vmem:[#allocation9 + $0x30] sm:$0xff]   ;;  %v1269_v20 = vld [vmem:[#allocation9 + $0x28] sm:$0xff]   ;;  %p1417_p10 = pnand %p1416_p8, %p1867_p7  ;;  %s1419_s16 = sshll.u32 %s1498_s7, 4  ;;  %s1420_s16 = int_to_ptr.vmem [resolvable:$false] %s1419_s16 }
  0x7c   : > { %1083 = vmatpush3.bf16.msra.mxu0 %v1252_v2  ;;  %1103 = vmatpush3.bf16.msra.mxu1 %v1260_v6  ;;  %v1270_v21 = vld [vmem:[#allocation9 + $0x20] sm:$0xff]   ;;  %v1004_v22 = vld [vmem:[%s1834_s2] ss:$0 sm:$0xff]  ;;  %v1271_v31 = vld [vmem:[#allocation9 + $0x18] sm:$0xff]   ;;  %s1421_s23 = scalar_lea.vmem %s1420_s16, 256  ;;  %p1422_p12 = scmp.lt.s32.totalorder %s1791_s24, %s1420_s16 }
  0x7d   : > { %1084 = vmatprep.subr.bf16.mxu0 %v1496_v0  ;;  %1104 = vmatprep.subr.bf16.mxu1 %v1496_v0  ;;  %v1272_v32 = vld [vmem:[#allocation9 + $0x10] sm:$0xff]   ;;  %v1273_v33 = vld [vmem:[#allocation9 + $0x8] sm:$0xff]   ;;  %v1274_v34 = vld [vmem:[#allocation9] sm:$0xff]   ;;  %p1418_p0 = pneg %p1417_p10  ;;  %p1423_p2 = scmp.lt.s32.totalorder %s1421_s23, %s1415_s15 }
  0x7e   : > { %v1275_v35 = vld [vmem:[#allocation11 + $0x38] sm:$0xff]   ;;  %v1276_v36 = vld [vmem:[#allocation11 + $0x30] sm:$0xff]   ;;  %v1277_v37 = vld [vmem:[#allocation11 + $0x28] sm:$0xff]  }
  0x7f   : > { %v1278_v38 = vld [vmem:[#allocation11 + $0x20] sm:$0xff]   ;;  %v1013_v39 = vld [vmem:[%s1836_s4] ss:$0 sm:$0xff]  ;;  %v1279_v48 = vld [vmem:[#allocation11 + $0x18] sm:$0xff]   ;;  %p1424_p9 = por %p1423_p2, %p1422_p12 }
  0x80   : > { %1085 = vmatpush3.bf16.msra.mxu0 %v1253_v3  ;;  %1105 = vmatpush3.bf16.msra.mxu1 %v1261_v8  ;;  %v1280_v49 = vld [vmem:[#allocation11 + $0x10] sm:$0xff]   ;;  %v1281_v50 = vld [vmem:[#allocation11 + $0x8] sm:$0xff]   ;;  %v1282_v51 = vld [vmem:[#allocation11] sm:$0xff]  }
  0x81   : > { %1086 = vmatprep.subr.bf16.mxu0 %v1496_v0  ;;  %1106 = vmatprep.subr.bf16.mxu1 %v1496_v0  ;;  %v1022_v52 = vld [vmem:[%s1838_s6] ss:$0 sm:$0xff]  ;;  %p1425_p11 = pnand %p1424_p9, %p1418_p0 }
  0x82   : > { %v1031_v61 = vld [vmem:[%s1840_s8] ss:$0 sm:$0xff] }
  0x84   : > { %1087 = vmatpush3.bf16.msra.mxu0 %v1254_v5  ;;  %1107 = vmatpush3.bf16.msra.mxu1 %v1262_v10 }
  0x85   : > { %1088 = vmatprep.subr.bf16.mxu0 %v1496_v0  ;;  %1108 = vmatprep.subr.bf16.mxu1 %v1496_v0 }
  0x88   : > { %1089 = vmatpush3.bf16.msra.mxu0 %v1255_v7  ;;  %1109 = vmatpush3.bf16.msra.mxu1 %v1263_v14 }
  0x89   : > { %1090 = vmatprep.subr.bf16.mxu0 %v1496_v0  ;;  %1110 = vmatprep.subr.bf16.mxu1 %v1496_v0 }
  0x8c   : > { %1091 = vmatpush3.bf16.msra.mxu0 %v1256_v9  ;;  %1111 = vmatpush3.bf16.msra.mxu1 %v1264_v15 }
  0x8d   : > { %1092 = vmatprep.subr.bf16.mxu0 %v1496_v0  ;;  %1112 = vmatprep.subr.bf16.mxu1 %v1496_v0 }
  0x90   : > { %1093 = vmatpush3.bf16.msra.mxu0 %v1257_v11  ;;  %1113 = vmatpush3.bf16.msra.mxu1 %v1265_v16 }
  0x91   : > { %1094 = vmatprep.subr.bf16.mxu0 %v1496_v0  ;;  %1114 = vmatprep.subr.bf16.mxu1 %v1496_v0 }
  0x94   : > { %1095 = vmatpush3.bf16.msra.mxu0 %v1258_v12  ;;  %1115 = vmatpush3.bf16.msra.mxu1 %v1266_v17 }
  0x95   : > { %1120 = vmatprep.subr.bf16.mxu0 %v1496_v0  ;;  %1140 = vmatprep.subr.bf16.mxu1 %v1496_v0 }
  0x97   : > { %1097 = vmatmul.mubr.bf16.vlgmr.msra.gmra.mxu0 %v407_v13 }
  0x98   : > { %1136 = vmatprep.mubr.msk.bf16.mxu0 %vm1497_vm0, %v1496_v0  ;;  %1121 = vmatpush3.bf16.msra.mxu0 %v1267_v18 }
  0x99   : > { %1122 = vmatprep.subr.bf16.mxu0 %v1496_v0 }
  0x9c   : > { %1123 = vmatpush3.bf16.msra.mxu0 %v1268_v19 }
  0x9d   : > { %1124 = vmatprep.subr.bf16.mxu0 %v1496_v0 }
  0xa0   : > { %1125 = vmatpush3.bf16.msra.mxu0 %v1269_v20 }
  0xa1   : > { %1126 = vmatprep.subr.bf16.mxu0 %v1496_v0 }
  0xa4   : > { %1127 = vmatpush3.bf16.msra.mxu0 %v1270_v21 }
  0xa5   : > { %1128 = vmatprep.subr.bf16.mxu0 %v1496_v0 }
  0xa8   : > { %1129 = vmatpush3.bf16.msra.mxu0 %v1271_v31 }
  0xa9   : > { %1130 = vmatprep.subr.bf16.mxu0 %v1496_v0 }
  0xac   : > { %1131 = vmatpush3.bf16.msra.mxu0 %v1272_v32 }
  0xad   : > { %1132 = vmatprep.subr.bf16.mxu0 %v1496_v0 }
  0xb0   : > { %1133 = vmatpush3.bf16.msra.mxu0 %v1273_v33 }
  0xb1   : > { %1134 = vmatprep.subr.bf16.mxu0 %v1496_v0 }
  0xb4   : > { %1135 = vmatpush3.bf16.msra.mxu0 %v1274_v34 }
 0x157   : > { %v513_v23 = vpop.f32.mrf.mxu0 }
 0x158   : > { %v514_v24 = vadd.f32 %v1004_v22, %v513_v23 }
 0x159   : > { %v1098_v25 = vpop.f32.mrf.mxu0 }
 0x15a   : > { %v519_v26 = vmax.f32 %v514_v24, 0.0 }
 0x15b   : > { %v516_v27 = vpop.f32.mrf.mxu0 }
 0x15c   : > { %v520_v28 = vpack.c.bf16 %v519_v26, %v519_v26 }
 0x15d   : > { %v1099_v29 = vpop.f32.mrf.mxu0 }
 0x15e   : > { %521 = vst [vmem:[#allocation2] sm:$0xf] %v520_v28 }
 0x165   : > { %v522_v30 = vld [vmem:[#allocation2] sm:$0xf] }
 0x166   : > { %1117 = vmatmul.mubr.bf16.vlgmr.msra.gmra.mxu1 %v522_v30 }
 0x167   : > { %1156 = vmatprep.mubr.msk.bf16.mxu1 %vm1497_vm0, %v1496_v0  ;;  %1141 = vmatpush3.bf16.msra.mxu1 %v1275_v35 }
 0x168   : > { %1142 = vmatprep.subr.bf16.mxu1 %v1496_v0 }
 0x16b   : > { %1143 = vmatpush3.bf16.msra.mxu1 %v1276_v36 }
 0x16c   : > { %1144 = vmatprep.subr.bf16.mxu1 %v1496_v0 }
 0x16f   : > { %1145 = vmatpush3.bf16.msra.mxu1 %v1277_v37 }
 0x170   : > { %1146 = vmatprep.subr.bf16.mxu1 %v1496_v0 }
 0x173   : > { %1147 = vmatpush3.bf16.msra.mxu1 %v1278_v38 }
 0x174   : > { %1148 = vmatprep.subr.bf16.mxu1 %v1496_v0 }
 0x177   : > { %1149 = vmatpush3.bf16.msra.mxu1 %v1279_v48 }
 0x178   : > { %1150 = vmatprep.subr.bf16.mxu1 %v1496_v0 }
 0x17b   : > { %1151 = vmatpush3.bf16.msra.mxu1 %v1280_v49 }
 0x17c   : > { %1152 = vmatprep.subr.bf16.mxu1 %v1496_v0 }
 0x17f   : > { %1153 = vmatpush3.bf16.msra.mxu1 %v1281_v50 }
 0x180   : > { %1154 = vmatprep.subr.bf16.mxu1 %v1496_v0 }
 0x183   : > { %1155 = vmatpush3.bf16.msra.mxu1 %v1282_v51 }
 0x226   : > { %v628_v40 = vpop.f32.mrf.mxu1 }
 0x227   : > { %v629_v41 = vadd.f32 %v1013_v39, %v628_v40 }
 0x228   : > { %v1118_v42 = vpop.f32.mrf.mxu1 }
 0x229   : > { %v634_v43 = vmax.f32 %v629_v41, 0.0 }
 0x22a   : > { %v631_v44 = vpop.f32.mrf.mxu1 }
 0x22b   : > { %v635_v45 = vpack.c.bf16 %v634_v43, %v634_v43 }
 0x22c   : > { %v1119_v46 = vpop.f32.mrf.mxu1 }
 0x22d   : > { %636 = vst [vmem:[#allocation2] sm:$0xf] %v635_v45 }
 0x234   : > { %v637_v47 = vld [vmem:[#allocation2] sm:$0xf] }
 0x235   : > { %1137 = vmatmul.mubr.bf16.vlgmr.msra.gmra.mxu0 %v637_v47 }
 0x2f5   : > { %v743_v53 = vpop.f32.mrf.mxu0 }
 0x2f6   : > { %v744_v54 = vadd.f32 %v1022_v52, %v743_v53 }
 0x2f7   : > { %v1138_v55 = vpop.f32.mrf.mxu0 }
 0x2f8   : > { %v749_v56 = vmax.f32 %v744_v54, 0.0 }
 0x2f9   : > { %v746_v57 = vpop.f32.mrf.mxu0 }
 0x2fa   : > { %v750_v58 = vpack.c.bf16 %v749_v56, %v749_v56 }
 0x2fb   : > { %v1139_v59 = vpop.f32.mrf.mxu0 }
 0x2fc   : > { %751 = vst [vmem:[#allocation2] sm:$0xf] %v750_v58 }
 0x303   : > { %v752_v60 = vld [vmem:[#allocation2] sm:$0xf] }
 0x304   : > { %1157 = vmatmul.mubr.bf16.vlgmr.msra.gmra.mxu1 %v752_v60 }
 0x3c4   : > { %v858_v62 = vpop.f32.mrf.mxu1 }
 0x3c5   : > { %v859_v63 = vadd.f32 %v1031_v61, %v858_v62 }
 0x3c6   : > { %v1158_v0 = vpop.f32.mrf.mxu1 }
 0x3c7   : > { %v864_v1 = vmax.f32 %v859_v63, 0.0 }
 0x3c8   : > { %v861_v2 = vpop.f32.mrf.mxu1 }
 0x3c9   : > { %865 = vst [vmem:[%s405_s13] sm:$0xff] %v864_v1 }
 0x3ca   : > { %v1159_v3 = vpop.f32.mrf.mxu1 }
 0x3cb   : > { %1428 = shalt.err (!%p1425_p11)
}
 0x3cc   : > { %s1429_s25 = scalar_lea.hbm %s1789_s5, 128  ;;  %s1433_s28 = scalar_lea.hbm %s1841_s9, 256 }
 0x3cd   : > { %p1430_p13 = scmp.ne.s32.totalorder %s1789_s5, %s1429_s25  ;;  %p1434_p4 = scmp.lt.s32.totalorder %s1789_s5, %s1841_s9 }
 0x3ce   : > { %p1435_p6 = scmp.lt.s32.totalorder %s1433_s28, %s1429_s25 }
 0x3cf   : > { %p1431_p1 = pnand %p1430_p13, %p1867_p7 }
 0x3d0   : > { %p1436_p5 = por %p1435_p6, %p1434_p4 }
 0x3d1   : > { %p1432_p3 = pneg %p1431_p1 }
 0x3d3   : > { %p1437_p8 = pnand %p1436_p5, %p1432_p3 }
 0x3d5   : > { %1440 = shalt.err (!%p1437_p8)
}
 0x3d6   : > { %1178 = dma.vmem_to_hbm [thread:$0]  (%p1867_p7), %s1791_s24, 128, %s1789_s5, %s867_s1  }
 0x3d7 PF: > { %s892_s19 = sand.u32 1, %s1475_s30   ;;  %p1868_p10 = scmp.ne.s32.totalorder %s1859_s17, 0 }
 0x3d8   : > { %p1869_p0 = scmp.ge.s32.totalorder %s1487_s12, 2  ;;  %s893_s13 = scalar_lea.sflag [#allocation5], %s892_s19 }
 0x3da   : > { %p1198_p12 = pnand %p1869_p0, %p1868_p10 }
 0x3dc   : > { %p1199_p2 = pneg %p1198_p12 }
 0x3de   : > { %1470 = dma.done.wait (%p1199_p2), %s893_s13, 128  }
 0x3df   : > { %1472 = vsyncadd (%p1199_p2), %s893_s13, 4294967168  ;;  %p24_p9 = scmp.ge.s32.totalorder %s1650_s26, 4   ;;  %s1870_s30 = smov %s1479_s10 }
 0x3e0   : > { %s1871_s10 = smov %s1483_s11  ;;  %s1872_s11 = smov %s1661_s29 }
 0x3e1   : > { %s1873_s12 = smov %s1650_s26  ;;  %26 = sbr.rel (!%p24_p9) target bundleno = 12 (0xc), region = 117 }
 0x3e6   :  { %898 = vsyncpa [#allocation4], 1 }
 0x3e7   :  { %900 = vsyncpa [#allocation4 + $0x1], 1 }
 0x3e8   :  { %901 = vsyncpa [#allocation7], 1 }
 0x3e9   :  { %902 = vsyncpa [#allocation10], 1 }
 0x3ea   :  { %903 = vsyncpa [#allocation5], 1 }
 0x3eb   :  { %905 = vsyncpa [#allocation5 + $0x1], 1 }

// kernel: tpu_custom_call.1
= control target key start
LH: loop header
LB: loop body
LE: loop exit
PB: predicated region body
PF: predicated region fallthrough
CT: control target
= control target key end

     0   :  { %s1832_s0 = inlined_call_operand.hbm [shape: bf16[16,128], index: 0, kind: input, shape index: {}]   ;;  %s1833_s1 = inlined_call_operand.hbm [shape: bf16[128,128], index: 1, kind: input, shape index: {}]   ;;  %s1834_s2 = inlined_call_operand.vmem [shape: f32[1,128], index: 2, kind: input, shape index: {}]   ;;  %s1835_s3 = inlined_call_operand.hbm [shape: bf16[128,128], index: 3, kind: input, shape index: {}]   ;;  %s1836_s4 = inlined_call_operand.vmem [shape: f32[1,128], index: 4, kind: input, shape index: {}]   ;;  %s1837_s5 = inlined_call_operand.hbm [shape: bf16[128,128], index: 5, kind: input, shape index: {}]   ;;  %s1838_s6 = inlined_call_operand.vmem [shape: f32[1,128], index: 6, kind: input, shape index: {}]   ;;  %s1839_s7 = inlined_call_operand.hbm [shape: bf16[128,128], index: 7, kind: input, shape index: {}]   ;;  %s1840_s8 = inlined_call_operand.vmem [shape: f32[1,128], index: 8, kind: input, shape index: {}]   ;;  %s1841_s9 = inlined_call_operand.hbm [shape: f32[16,128], index: 9, kind: output, shape index: {}]  }
   0x1   :  { %1846 = sst [smem:[#allocation17_spill]] %s1833_s1 }
   0x2   :  { %1847 = sst [smem:[#allocation18_spill]] %s1835_s3 }
   0x3   :  { %1848 = sst [smem:[#allocation19_spill]] %s1837_s5 }
   0x4   :  { %1849 = sst [smem:[#allocation20_spill]] %s1839_s7 }
   0x5   :  { %14 = vsyncpa [#allocation4], 0 }
   0x6   :  { %16 = vsyncpa [#allocation4 + $0x1], 0 }
   0x7   :  { %17 = vsyncpa [#allocation7], 0 }
   0x8   :  { %18 = vsyncpa [#allocation10], 0 }
   0x9   :  { %19 = vsyncpa [#allocation5], 0 }
   0xa   :  { %21 = vsyncpa [#allocation5 + $0x1], 0  ;;  %s1549_s30 = smov 0   ;;  %s1551_s10 = smov 0  }
   0xb   :  { %s1553_s11 = smov 0   ;;  %s1555_s12 = smov 0  }
   0xc LB: > { %s1489_s13 = smov [#allocation6]   ;;  %s1570_s15 = sadd.s32 4294967295, %s1487_s12   ;;  %s1487_s12 = sphi %s1555_s12, %s1873_s12   ;;  %s1483_s11 = sphi %s1553_s11, %s1872_s11   ;;  %s1479_s10 = sphi %s1551_s10, %s1871_s10   ;;  %s1475_s30 = sphi %s1549_s30, %s1870_s30  }
   0xd   : > { %s264_s14 = sshll.u32 %s1489_s13, 4  ;;  %p989_p0 = scmp.ge.s32.totalorder %s1487_s12, 1  ;;  %s265_s14 = int_to_ptr.vmem [resolvable:$true] %s264_s14 }
   0xe   : > { %p1842_p1 = scmp.eq.s32.totalorder %s1570_s15, 0  ;;  %p252_p2 = scmp.lt.s32.totalorder %s1487_s12, 3 }
   0xf   : > { %s1490_s17 = smov [#allocation9]   ;;  %s1491_s20 = smov [#allocation8]  }
  0x10   : > { %p1575_p3 = pnand %p989_p0, %p252_p2  ;;  %s296_s18 = sshll.u32 %s1490_s17, 4  ;;  %s1588_s18 = int_to_ptr.vmem [resolvable:$true] %s296_s18 }
  0x11   : > { %s280_s21 = sshll.u32 %s1491_s20, 4  ;;  %s1294_s22 = scalar_lea.vmem %s265_s14, 1024  ;;  %s1590_s21 = int_to_ptr.vmem [resolvable:$true] %s280_s21 }
  0x12   : > { %s1850_s16 = scalar_select %p1575_p3, 1, 0 }
  0x13   : > { %p1180_p5 = pneg %p1575_p3  ;;  %p1295_p8 = scmp.ne.s32.totalorder %s265_s14, %s1294_s22 }
  0x14   : > { %p1302_p11 = scmp.lt.s32.totalorder %s265_s14, %s265_s14  ;;  %p1303_p12 = scmp.lt.s32.totalorder %s1294_s22, %s1294_s22 }
  0x15   : > { %p1584_p6 = pnand %p1180_p5, %p1842_p1 }
  0x16   : > { %p1304_p13 = por %p1303_p12, %p1302_p11 }
  0x17   : > { %p1285_p7 = pneg %p1584_p6 }
  0x19   : > { %p1297_p9 = pnand %p1295_p8, %p1285_p7 }
  0x1b   : > { %p1298_p10 = pneg %p1297_p9 }
  0x1d   : > { %p1305_p0 = pnand %p1304_p13, %p1298_p10 }
  0x1f   : > { %1308 = shalt.err (!%p1305_p0)
}
  0x20   : > { %s1492_s23 = smov 64   ;;  %s1493_s24 = smov 4  }
  0x21   : > { %s1852_s1 = sld [smem:[#allocation17_spill]]  ;;  %s1320_s27 = scalar_lea.vmem %s1588_s18, 1024 }
  0x22   : > { %p1321_p2 = scmp.ne.s32.totalorder %s1588_s18, %s1320_s27  ;;  %p1328_p9 = scmp.lt.s32.totalorder %s1588_s18, %s1588_s18 }
  0x23   : > { %p1329_p10 = scmp.lt.s32.totalorder %s1320_s27, %s1320_s27 }
  0x24   : > { %p1323_p5 = pnand %p1321_p2, %p1285_p7 }
  0x25   : > { %p1330_p11 = por %p1329_p10, %p1328_p9 }
  0x26   : > { %p1324_p8 = pneg %p1323_p5 }
  0x27   : > { %1183 = dma.hbm_to_vmem [thread:$0]  (!%p1584_p6), %s1852_s1, 1024, %s265_s14, [#allocation7], %s1492_s23, %s1492_s23, %s1493_s24  }
  0x28   : > { %p1331_p12 = pnand %p1330_p11, %p1324_p8 }
  0x2a   : > { %1334 = shalt.err (!%p1331_p12)
}
  0x2b   : > { %s1853_s5 = sld [smem:[#allocation19_spill]]  ;;  %s1346_s13 = scalar_lea.vmem %s1590_s21, 1024 }
  0x2c   : > { %p1347_p13 = scmp.ne.s32.totalorder %s1590_s21, %s1346_s13  ;;  %p1354_p5 = scmp.lt.s32.totalorder %s1590_s21, %s1590_s21 }
  0x2d   : > { %p1355_p8 = scmp.lt.s32.totalorder %s1346_s13, %s1346_s13 }
  0x2e   : > { %p1349_p0 = pnand %p1347_p13, %p1285_p7 }
  0x2f   : > { %p1356_p9 = por %p1355_p8, %p1354_p5 }
  0x30   : > { %p1350_p2 = pneg %p1349_p0 }
  0x31   : > { %1189 = dma.hbm_to_vmem [thread:$0]  (!%p1584_p6), %s1853_s5, 1024, %s1588_s18, [#allocation10], %s1492_s23, %s1492_s23, %s1493_s24  }
  0x32   : > { %p1357_p10 = pnand %p1356_p9, %p1350_p2 }
  0x34   : > { %1360 = shalt.err (!%p1357_p10)
}
  0x35   : > { %s1854_s3 = sld [smem:[#allocation18_spill]]  ;;  %s1494_s18 = smov [#allocation11]  }
  0x36   : > { %s312_s20 = sshll.u32 %s1494_s18, 4  ;;  %s313_s20 = int_to_ptr.vmem [resolvable:$true] %s312_s20 }
  0x37   : > { %s1372_s22 = scalar_lea.vmem %s313_s20, 1024  ;;  %p1380_p0 = scmp.lt.s32.totalorder %s313_s20, %s313_s20 }
  0x38   : > { %p1373_p11 = scmp.ne.s32.totalorder %s313_s20, %s1372_s22  ;;  %p1381_p2 = scmp.lt.s32.totalorder %s1372_s22, %s1372_s22 }
  0x3a   : > { %p1375_p12 = pnand %p1373_p11, %p1285_p7  ;;  %p1382_p5 = por %p1381_p2, %p1380_p0 }
  0x3b   : > { %1186 = dma.hbm_to_vmem [thread:$0]  (!%p1584_p6), %s1854_s3, 1024, %s1590_s21, [#allocation7], %s1492_s23, %s1492_s23, %s1493_s24  }
  0x3c   : > { %p1376_p13 = pneg %p1375_p12 }
  0x3e   : > { %p1383_p8 = pnand %p1382_p5, %p1376_p13 }
  0x40   : > { %1386 = shalt.err (!%p1383_p8)
}
  0x41   : > { %s1855_s7 = sld [smem:[#allocation20_spill]]  ;;  %s988_s19 = sadd.s32 4294967294, %s1487_s12  }
  0x42   : > { %s1650_s26 = sadd.s32 1, %s1487_s12   ;;  %s34_s28 = sadd.s32 1, %s1483_s11 }
  0x43   : > { %s31_s27 = ssub.s32 %s1487_s12, %s1650_s26  ;;  %p41_p9 = scmp.ne.s32.totalorder %s1483_s11, %s1479_s10 }
  0x44   : > { %p32_p7 = scmp.eq.s32.totalorder %s31_s27, 0  ;;  %p42_p10 = scmp.eq.s32.totalorder %s1487_s12, 0 }
  0x45   : > { %p47_p11 = scmp.ne.s32.totalorder %s1479_s10, %s1475_s30  ;;  %p239_p13 = scmp.eq.s32.totalorder %s1570_s15, 1 }
  0x46   : > { %s1661_s29 = scalar_select %p32_p7, %s1483_s11, %s34_s28  }
  0x47   : > { %1192 = dma.hbm_to_vmem [thread:$0]  (!%p1584_p6), %s1855_s7, 1024, %s313_s20, [#allocation10], %s1492_s23, %s1492_s23, %s1493_s24  }
  0x48   : > { %p1663_p12 = por %p42_p10, %p41_p9  ;;  %p1669_p6 = por %p1842_p1, %p47_p11 }
  0x49   : > { %p245_p0 = scmp.eq.s32.totalorder %s988_s19, 1  ;;  %p1205_p2 = scmp.lt.s32.totalorder %s1487_s12, 2 }
  0x4a   : > { %s1857_s23 = scalar_select %p1669_p6, 1, 0 }
  0x4b   : > { %s329_s24 = sand.u32 1, %s1483_s11   ;;  %p1676_p5 = por %p239_p13, %p41_p9 }
  0x4c   : > { %p1680_p8 = por %p245_p0, %p47_p11  ;;  %s995_s18 = sshll.u32 %s329_s24, 2 }
  0x4d   : > { %s1858_s14 = scalar_select %p1676_p5, 1, 0 }
  0x4e   : > { %s1859_s17 = scalar_select %p1680_p8, 1, 0 }
  0x4f   : > { %s996_s20 = sshll.u32 %s1487_s12, 6  ;;  %s333_s19 = scalar_lea.vmem [#allocation3], %s995_s18 }
  0x50   : > { %s1688_s25 = scalar_lea.hbm %s1832_s0, %s996_s20  ;;  %s340_s27 = sshll.u32 %s333_s19, 4  ;;  %s341_s27 = int_to_ptr.vmem [resolvable:$true] %s340_s27 }
  0x51   : > { %p1692_p7 = pnand %p1205_p2, %p1663_p12  ;;  %s330_s1 = scalar_lea.sflag [#allocation4], %s329_s24 }
  0x52   : > { %s1387_s3 = scalar_lea.hbm %s1688_s25, 64  ;;  %s1392_s21 = scalar_lea.hbm %s1832_s0, 128 }
  0x53   : > { %p1388_p9 = scmp.ne.s32.totalorder %s1688_s25, %s1387_s3  ;;  %p1389_p10 = pneg %p1692_p7 }
  0x54   : > { %p1393_p0 = scmp.lt.s32.totalorder %s1688_s25, %s1832_s0  ;;  %p1394_p12 = scmp.lt.s32.totalorder %s1392_s21, %s1387_s3 }
  0x55   : > { %p1390_p11 = pnand %p1389_p10, %p1388_p9 }
  0x56   : > { %p1395_p2 = por %p1394_p12, %p1393_p0 }
  0x57   : > { %p1391_p13 = pneg %p1390_p11 }
  0x59   : > { %p1396_p4 = pnand %p1395_p2, %p1391_p13 }
  0x5b   : > { %1399 = shalt.err (!%p1396_p4)
}
  0x5c   : > { %s1400_s13 = scalar_lea.vmem %s341_s27, 64  ;;  %s1495_s24 = smov [#allocation3]  }
  0x5d   : > { %p1401_p1 = scmp.ne.s32.totalorder %s341_s27, %s1400_s13  ;;  %s1405_s5 = sshll.u32 %s1495_s24, 4  ;;  %s1406_s5 = int_to_ptr.vmem [resolvable:$false] %s1405_s5 }
  0x5e   : > { %s1407_s7 = scalar_lea.vmem %s1406_s5, 128  ;;  %p1408_p9 = scmp.lt.s32.totalorder %s341_s27, %s1406_s5 }
  0x5f   : > { %p1403_p8 = pnand %p1401_p1, %p1389_p10  ;;  %p1409_p11 = scmp.lt.s32.totalorder %s1407_s7, %s1400_s13 }
  0x61   : > { %p1404_p5 = pneg %p1403_p8  ;;  %p1410_p6 = por %p1409_p11, %p1408_p9 }
  0x63   : > { %p1411_p3 = pnand %p1410_p6, %p1404_p5 }
  0x65   : > { %1414 = shalt.err (!%p1411_p3)
}
  0x66   : > { %1196 = dma.hbm_to_vmem [thread:$0]  (!%p1692_p7), %s1688_s25, 64, %s341_s27, %s330_s1  }
  0x67   : > { %p1861_p13 = scmp.ne.s32.totalorder %s1850_s16, 0 }
  0x68   : > { %s1713_s3 = sand.u32 (!%p1861_p13), 1, %s1479_s10   ;;  %p1862_p1 = scmp.ne.s32.totalorder (!%p1861_p13), %s1857_s23, 0 }
  0x69   : > { %349 = sbr.rel (%p1861_p13) target bundleno = 983 (0x3d7), region = 56  ;;  %s998_s20 = sshll.u32 (!%p1861_p13), %s1713_s3, 2 }
  0x6a   : > { %s352_s22 = scalar_lea.sflag (!%p1861_p13), [#allocation4], %s1713_s3  ;;  %s1717_s5 = scalar_lea.vmem (!%p1861_p13), [#allocation3], %s998_s20 }
  0x6e   : > { %1458 = dma.done.wait (%p1862_p1), %s352_s22, 64  }
  0x6f   : > { %1460 = vsyncadd (%p1862_p1), %s352_s22, 4294967232  ;;  %p1863_p3 = scmp.eq.s32.totalorder %s1570_s15, 0 }
  0x71   : > { %1462 = dma.done.wait (%p1863_p3), [#allocation7], 2048   ;;  %p1864_p4 = pmov %p1863_p3 }
  0x72   : > { %p1865_p6 = pmov %p1863_p3 }
  0x73   : > { %1464 = vsyncadd (%p1864_p4), [#allocation7], 4294965248 }
  0x74   : > { %1466 = dma.done.wait (%p1865_p6), [#allocation10], 2048   ;;  %p1866_p5 = pmov %p1863_p3 }
  0x75   : > { %v1496_v0 = vmov 0.0   ;;  %vm1497_vm0 = vmmov 0   ;;  %v1251_v1 = vld [vmem:[#allocation6 + $0x38] sm:$0xff]   ;;  %v1252_v2 = vld [vmem:[#allocation6 + $0x30] sm:$0xff]   ;;  %v1253_v3 = vld [vmem:[#allocation6 + $0x28] sm:$0xff]   ;;  %s1003_s28 = sshll.u32 %s1713_s3, 3 }
  0x76   : > { %1468 = vsyncadd (%p1866_p5), [#allocation10], 4294965248  ;;  %1080 = vmatprep.subr.bf16.mxu0 %v1496_v0  ;;  %1096 = vmatprep.mubr.msk.bf16.mxu0 %vm1497_vm0, %v1496_v0  ;;  %v1259_v4 = vld [vmem:[#allocation8 + $0x38] sm:$0xff]   ;;  %v1254_v5 = vld [vmem:[#allocation6 + $0x20] sm:$0xff]   ;;  %s1041_s19 = sshll.u32 %s1570_s15, 7  ;;  %s405_s13 = scalar_lea.vmem [#allocation12], %s1003_s28 }
  0x77   : > { %1100 = vmatprep.subr.bf16.mxu1 %v1496_v0  ;;  %1116 = vmatprep.mubr.msk.bf16.mxu1 %vm1497_vm0, %v1496_v0  ;;  %v1260_v6 = vld [vmem:[#allocation8 + $0x30] sm:$0xff]   ;;  %v1255_v7 = vld [vmem:[#allocation6 + $0x18] sm:$0xff]   ;;  %v1261_v8 = vld [vmem:[#allocation8 + $0x28] sm:$0xff]   ;;  %s880_s24 = sshll.u32 %s405_s13, 4  ;;  %s867_s1 = scalar_lea.sflag [#allocation5], %s1713_s3  ;;  %s1791_s24 = int_to_ptr.vmem [resolvable:$true] %s880_s24 }
  0x78   : > { %1081 = vmatpush3.bf16.msra.mxu0 %v1251_v1  ;;  %1101 = vmatpush3.bf16.msra.mxu1 %v1259_v4  ;;  %v1256_v9 = vld [vmem:[#allocation6 + $0x10] sm:$0xff]   ;;  %v1262_v10 = vld [vmem:[#allocation8 + $0x20] sm:$0xff]   ;;  %v1257_v11 = vld [vmem:[#allocation6 + $0x8] sm:$0xff]   ;;  %s1415_s15 = scalar_lea.vmem %s1791_s24, 128  ;;  %p1867_p7 = scmp.ne.s32.totalorder %s1858_s14, 0 }
  0x79   : > { %1082 = vmatprep.subr.bf16.mxu0 %v1496_v0  ;;  %1102 = vmatprep.subr.bf16.mxu1 %v1496_v0  ;;  %v1258_v12 = vld [vmem:[#allocation6] sm:$0xff]   ;;  %v407_v13 = vld [vmem:[%s1717_s5] sm:$0xf]  ;;  %v1264_v15 = vld [vmem:[#allocation8 + $0x10] sm:$0xff]   ;;  %s1789_s5 = scalar_lea.hbm %s1841_s9, %s1041_s19  ;;  %p1416_p8 = scmp.ne.s32.totalorder %s1791_s24, %s1415_s15 }
  0x7a   : > { %v1263_v14 = vld [vmem:[#allocation8 + $0x18] sm:$0xff]   ;;  %v1265_v16 = vld [vmem:[#allocation8 + $0x8] sm:$0xff]   ;;  %v1266_v17 = vld [vmem:[#allocation8] sm:$0xff]   ;;  %s1498_s7 = smov [#allocation12]  }
  0x7b   : > { %v1267_v18 = vld [vmem:[#allocation9 + $0x38] sm:$0xff]   ;;  %v1268_v19 = vld [vmem:[#allocation9 + $0x30] sm:$0xff]   ;;  %v1269_v20 = vld [vmem:[#allocation9 + $0x28] sm:$0xff]   ;;  %p1417_p10 = pnand %p1416_p8, %p1867_p7  ;;  %s1419_s16 = sshll.u32 %s1498_s7, 4  ;;  %s1420_s16 = int_to_ptr.vmem [resolvable:$false] %s1419_s16 }
  0x7c   : > { %1083 = vmatpush3.bf16.msra.mxu0 %v1252_v2  ;;  %1103 = vmatpush3.bf16.msra.mxu1 %v1260_v6  ;;  %v1270_v21 = vld [vmem:[#allocation9 + $0x20] sm:$0xff]   ;;  %v1004_v22 = vld [vmem:[%s1834_s2] ss:$0 sm:$0xff]  ;;  %v1271_v31 = vld [vmem:[#allocation9 + $0x18] sm:$0xff]   ;;  %s1421_s23 = scalar_lea.vmem %s1420_s16, 256  ;;  %p1422_p12 = scmp.lt.s32.totalorder %s1791_s24, %s1420_s16 }
  0x7d   : > { %1084 = vmatprep.subr.bf16.mxu0 %v1496_v0  ;;  %1104 = vmatprep.subr.bf16.mxu1 %v1496_v0  ;;  %v1272_v32 = vld [vmem:[#allocation9 + $0x10] sm:$0xff]   ;;  %v1273_v33 = vld [vmem:[#allocation9 + $0x8] sm:$0xff]   ;;  %v1274_v34 = vld [vmem:[#allocation9] sm:$0xff]   ;;  %p1418_p0 = pneg %p1417_p10  ;;  %p1423_p2 = scmp.lt.s32.totalorder %s1421_s23, %s1415_s15 }
  0x7e   : > { %v1275_v35 = vld [vmem:[#allocation11 + $0x38] sm:$0xff]   ;;  %v1276_v36 = vld [vmem:[#allocation11 + $0x30] sm:$0xff]   ;;  %v1277_v37 = vld [vmem:[#allocation11 + $0x28] sm:$0xff]  }
  0x7f   : > { %v1278_v38 = vld [vmem:[#allocation11 + $0x20] sm:$0xff]   ;;  %v1013_v39 = vld [vmem:[%s1836_s4] ss:$0 sm:$0xff]  ;;  %v1279_v48 = vld [vmem:[#allocation11 + $0x18] sm:$0xff]   ;;  %p1424_p9 = por %p1423_p2, %p1422_p12 }
  0x80   : > { %1085 = vmatpush3.bf16.msra.mxu0 %v1253_v3  ;;  %1105 = vmatpush3.bf16.msra.mxu1 %v1261_v8  ;;  %v1280_v49 = vld [vmem:[#allocation11 + $0x10] sm:$0xff]   ;;  %v1281_v50 = vld [vmem:[#allocation11 + $0x8] sm:$0xff]   ;;  %v1282_v51 = vld [vmem:[#allocation11] sm:$0xff]  }
  0x81   : > { %1086 = vmatprep.subr.bf16.mxu0 %v1496_v0  ;;  %1106 = vmatprep.subr.bf16.mxu1 %v1496_v0  ;;  %v1022_v52 = vld [vmem:[%s1838_s6] ss:$0 sm:$0xff]  ;;  %p1425_p11 = pnand %p1424_p9, %p1418_p0 }
  0x82   : > { %v1031_v61 = vld [vmem:[%s1840_s8] ss:$0 sm:$0xff] }
  0x84   : > { %1087 = vmatpush3.bf16.msra.mxu0 %v1254_v5  ;;  %1107 = vmatpush3.bf16.msra.mxu1 %v1262_v10 }
  0x85   : > { %1088 = vmatprep.subr.bf16.mxu0 %v1496_v0  ;;  %1108 = vmatprep.subr.bf16.mxu1 %v1496_v0 }
  0x88   : > { %1089 = vmatpush3.bf16.msra.mxu0 %v1255_v7  ;;  %1109 = vmatpush3.bf16.msra.mxu1 %v1263_v14 }
  0x89   : > { %1090 = vmatprep.subr.bf16.mxu0 %v1496_v0  ;;  %1110 = vmatprep.subr.bf16.mxu1 %v1496_v0 }
  0x8c   : > { %1091 = vmatpush3.bf16.msra.mxu0 %v1256_v9  ;;  %1111 = vmatpush3.bf16.msra.mxu1 %v1264_v15 }
  0x8d   : > { %1092 = vmatprep.subr.bf16.mxu0 %v1496_v0  ;;  %1112 = vmatprep.subr.bf16.mxu1 %v1496_v0 }
  0x90   : > { %1093 = vmatpush3.bf16.msra.mxu0 %v1257_v11  ;;  %1113 = vmatpush3.bf16.msra.mxu1 %v1265_v16 }
  0x91   : > { %1094 = vmatprep.subr.bf16.mxu0 %v1496_v0  ;;  %1114 = vmatprep.subr.bf16.mxu1 %v1496_v0 }
  0x94   : > { %1095 = vmatpush3.bf16.msra.mxu0 %v1258_v12  ;;  %1115 = vmatpush3.bf16.msra.mxu1 %v1266_v17 }
  0x95   : > { %1120 = vmatprep.subr.bf16.mxu0 %v1496_v0  ;;  %1140 = vmatprep.subr.bf16.mxu1 %v1496_v0 }
  0x97   : > { %1097 = vmatmul.mubr.bf16.vlgmr.msra.gmra.mxu0 %v407_v13 }
  0x98   : > { %1136 = vmatprep.mubr.msk.bf16.mxu0 %vm1497_vm0, %v1496_v0  ;;  %1121 = vmatpush3.bf16.msra.mxu0 %v1267_v18 }
  0x99   : > { %1122 = vmatprep.subr.bf16.mxu0 %v1496_v0 }
  0x9c   : > { %1123 = vmatpush3.bf16.msra.mxu0 %v1268_v19 }
  0x9d   : > { %1124 = vmatprep.subr.bf16.mxu0 %v1496_v0 }
  0xa0   : > { %1125 = vmatpush3.bf16.msra.mxu0 %v1269_v20 }
  0xa1   : > { %1126 = vmatprep.subr.bf16.mxu0 %v1496_v0 }
  0xa4   : > { %1127 = vmatpush3.bf16.msra.mxu0 %v1270_v21 }
  0xa5   : > { %1128 = vmatprep.subr.bf16.mxu0 %v1496_v0 }
  0xa8   : > { %1129 = vmatpush3.bf16.msra.mxu0 %v1271_v31 }
  0xa9   : > { %1130 = vmatprep.subr.bf16.mxu0 %v1496_v0 }
  0xac   : > { %1131 = vmatpush3.bf16.msra.mxu0 %v1272_v32 }
  0xad   : > { %1132 = vmatprep.subr.bf16.mxu0 %v1496_v0 }
  0xb0   : > { %1133 = vmatpush3.bf16.msra.mxu0 %v1273_v33 }
  0xb1   : > { %1134 = vmatprep.subr.bf16.mxu0 %v1496_v0 }
  0xb4   : > { %1135 = vmatpush3.bf16.msra.mxu0 %v1274_v34 }
 0x157   : > { %v513_v23 = vpop.f32.mrf.mxu0 }
 0x158   : > { %v514_v24 = vadd.f32 %v1004_v22, %v513_v23 }
 0x159   : > { %v1098_v25 = vpop.f32.mrf.mxu0 }
 0x15a   : > { %v519_v26 = vmax.f32 %v514_v24, 0.0 }
 0x15b   : > { %v516_v27 = vpop.f32.mrf.mxu0 }
 0x15c   : > { %v520_v28 = vpack.c.bf16 %v519_v26, %v519_v26 }
 0x15d   : > { %v1099_v29 = vpop.f32.mrf.mxu0 }
 0x15e   : > { %521 = vst [vmem:[#allocation2] sm:$0xf] %v520_v28 }
 0x165   : > { %v522_v30 = vld [vmem:[#allocation2] sm:$0xf] }
 0x166   : > { %1117 = vmatmul.mubr.bf16.vlgmr.msra.gmra.mxu1 %v522_v30 }
 0x167   : > { %1156 = vmatprep.mubr.msk.bf16.mxu1 %vm1497_vm0, %v1496_v0  ;;  %1141 = vmatpush3.bf16.msra.mxu1 %v1275_v35 }
 0x168   : > { %1142 = vmatprep.subr.bf16.mxu1 %v1496_v0 }
 0x16b   : > { %1143 = vmatpush3.bf16.msra.mxu1 %v1276_v36 }
 0x16c   : > { %1144 = vmatprep.subr.bf16.mxu1 %v1496_v0 }
 0x16f   : > { %1145 = vmatpush3.bf16.msra.mxu1 %v1277_v37 }
 0x170   : > { %1146 = vmatprep.subr.bf16.mxu1 %v1496_v0 }
 0x173   : > { %1147 = vmatpush3.bf16.msra.mxu1 %v1278_v38 }
 0x174   : > { %1148 = vmatprep.subr.bf16.mxu1 %v1496_v0 }
 0x177   : > { %1149 = vmatpush3.bf16.msra.mxu1 %v1279_v48 }
 0x178   : > { %1150 = vmatprep.subr.bf16.mxu1 %v1496_v0 }
 0x17b   : > { %1151 = vmatpush3.bf16.msra.mxu1 %v1280_v49 }
 0x17c   : > { %1152 = vmatprep.subr.bf16.mxu1 %v1496_v0 }
 0x17f   : > { %1153 = vmatpush3.bf16.msra.mxu1 %v1281_v50 }
 0x180   : > { %1154 = vmatprep.subr.bf16.mxu1 %v1496_v0 }
 0x183   : > { %1155 = vmatpush3.bf16.msra.mxu1 %v1282_v51 }
 0x226   : > { %v628_v40 = vpop.f32.mrf.mxu1 }
 0x227   : > { %v629_v41 = vadd.f32 %v1013_v39, %v628_v40 }
 0x228   : > { %v1118_v42 = vpop.f32.mrf.mxu1 }
 0x229   : > { %v634_v43 = vmax.f32 %v629_v41, 0.0 }
 0x22a   : > { %v631_v44 = vpop.f32.mrf.mxu1 }
 0x22b   : > { %v635_v45 = vpack.c.bf16 %v634_v43, %v634_v43 }
 0x22c   : > { %v1119_v46 = vpop.f32.mrf.mxu1 }
 0x22d   : > { %636 = vst [vmem:[#allocation2] sm:$0xf] %v635_v45 }
 0x234   : > { %v637_v47 = vld [vmem:[#allocation2] sm:$0xf] }
 0x235   : > { %1137 = vmatmul.mubr.bf16.vlgmr.msra.gmra.mxu0 %v637_v47 }
 0x2f5   : > { %v743_v53 = vpop.f32.mrf.mxu0 }
 0x2f6   : > { %v744_v54 = vadd.f32 %v1022_v52, %v743_v53 }
 0x2f7   : > { %v1138_v55 = vpop.f32.mrf.mxu0 }
 0x2f8   : > { %v749_v56 = vmax.f32 %v744_v54, 0.0 }
 0x2f9   : > { %v746_v57 = vpop.f32.mrf.mxu0 }
 0x2fa   : > { %v750_v58 = vpack.c.bf16 %v749_v56, %v749_v56 }
 0x2fb   : > { %v1139_v59 = vpop.f32.mrf.mxu0 }
 0x2fc   : > { %751 = vst [vmem:[#allocation2] sm:$0xf] %v750_v58 }
 0x303   : > { %v752_v60 = vld [vmem:[#allocation2] sm:$0xf] }
 0x304   : > { %1157 = vmatmul.mubr.bf16.vlgmr.msra.gmra.mxu1 %v752_v60 }
 0x3c4   : > { %v858_v62 = vpop.f32.mrf.mxu1 }
 0x3c5   : > { %v859_v63 = vadd.f32 %v1031_v61, %v858_v62 }
 0x3c6   : > { %v1158_v0 = vpop.f32.mrf.mxu1 }
 0x3c7   : > { %v864_v1 = vmax.f32 %v859_v63, 0.0 }
 0x3c8   : > { %v861_v2 = vpop.f32.mrf.mxu1 }
 0x3c9   : > { %865 = vst [vmem:[%s405_s13] sm:$0xff] %v864_v1 }
 0x3ca   : > { %v1159_v3 = vpop.f32.mrf.mxu1 }
 0x3cb   : > { %1428 = shalt.err (!%p1425_p11)
}
 0x3cc   : > { %s1429_s25 = scalar_lea.hbm %s1789_s5, 128  ;;  %s1433_s28 = scalar_lea.hbm %s1841_s9, 256 }
 0x3cd   : > { %p1430_p13 = scmp.ne.s32.totalorder %s1789_s5, %s1429_s25  ;;  %p1434_p4 = scmp.lt.s32.totalorder %s1789_s5, %s1841_s9 }
 0x3ce   : > { %p1435_p6 = scmp.lt.s32.totalorder %s1433_s28, %s1429_s25 }
 0x3cf   : > { %p1431_p1 = pnand %p1430_p13, %p1867_p7 }
 0x3d0   : > { %p1436_p5 = por %p1435_p6, %p1434_p4 }
 0x3d1   : > { %p1432_p3 = pneg %p1431_p1 }
 0x3d3   : > { %p1437_p8 = pnand %p1436_p5, %p1432_p3 }
 0x3d5   : > { %1440 = shalt.err (!%p1437_p8)
}
 0x3d6   : > { %1178 = dma.vmem_to_hbm [thread:$0]  (%p1867_p7), %s1791_s24, 128, %s1789_s5, %s867_s1  }
 0x3d7 PF: > { %s892_s19 = sand.u32 1, %s1475_s30   ;;  %p1868_p10 = scmp.ne.s32.totalorder %s1859_s17, 0 }
 0x3d8   : > { %p1869_p0 = scmp.ge.s32.totalorder %s1487_s12, 2  ;;  %s893_s13 = scalar_lea.sflag [#allocation5], %s892_s19 }
 0x3da   : > { %p1198_p12 = pnand %p1869_p0, %p1868_p10 }
 0x3dc   : > { %p1199_p2 = pneg %p1198_p12 }
 0x3de   : > { %1470 = dma.done.wait (%p1199_p2), %s893_s13, 128  }
 0x3df   : > { %1472 = vsyncadd (%p1199_p2), %s893_s13, 4294967168  ;;  %p24_p9 = scmp.ge.s32.totalorder %s1650_s26, 4   ;;  %s1870_s30 = smov %s1479_s10 }
 0x3e0   : > { %s1871_s10 = smov %s1483_s11  ;;  %s1872_s11 = smov %s1661_s29 }
 0x3e1   : > { %s1873_s12 = smov %s1650_s26  ;;  %26 = sbr.rel (!%p24_p9) target bundleno = 12 (0xc), region = 117 }
 0x3e6   :  { %898 = vsyncpa [#allocation4], 1 }
 0x3e7   :  { %900 = vsyncpa [#allocation4 + $0x1], 1 }
 0x3e8   :  { %901 = vsyncpa [#allocation7], 1 }
 0x3e9   :  { %902 = vsyncpa [#allocation10], 1 }
 0x3ea   :  { %903 = vsyncpa [#allocation5], 1 }
 0x3eb   :  { %905 = vsyncpa [#allocation5 + $0x1], 1 }

</bundles_post_ra>
